<compile_context>
chip_gen: v7x
topology: tpu7x:2x2x1
jax: 0.10.0
libtpu: 0.0.40
codegen_flags: <defaults>
</compile_context>

<pallas_src>
import functools

import numpy as np

import jax
import jax.numpy as jnp
from jax.experimental import pallas as pl
from jax.experimental.pallas import tpu as pltpu


_NEG_INF = np.float32(-1e30)   # logit value for padded output classes


# --------------------------------------------------------------------------
# Faithful port of the module's same_padding helper (init-time only).
# --------------------------------------------------------------------------
def same_padding(in_size, filter_size, stride_size):
    in_height, in_width = in_size
    if isinstance(filter_size, int):
        filter_height, filter_width = filter_size, filter_size
    else:
        filter_height, filter_width = filter_size
    if isinstance(stride_size, (int, float)):
        stride_height, stride_width = int(stride_size), int(stride_size)
    else:
        stride_height, stride_width = int(stride_size[0]), int(stride_size[1])
    out_height = np.ceil(in_height / stride_height)
    out_width = np.ceil(in_width / stride_width)
    pad_along_height = int((out_height - 1) * stride_height + filter_height - in_height)
    pad_along_width = int((out_width - 1) * stride_width + filter_width - in_width)
    pad_top = 0 if pad_along_height == 0 else max(pad_along_height // 2, 1)
    pad_left = 0 if pad_along_width == 0 else max(pad_along_width // 2, 1)
    padding = (pad_left, pad_top)   # NOTE: passed verbatim to Conv2d(padding=...)
    output = (int(out_height), int(out_width))
    return padding, output


def _round_up(x, m):
    return ((x + m - 1) // m) * m


# --------------------------------------------------------------------------
# Init-time lowering of a Conv2d to a dense GEMM operand.
#
# Rows index the conv input flattened NCHW-style:  ci*Hin*Win + h*Win + w
#   (input zero padding is folded in by dropping out-of-bounds taps, so the
#    activation matrix fed to the GEMM is just the flattened raw input).
# Cols index the conv output flattened NCHW-style WITH the next conv's zero
#   pad ring already in place:  co*OHp*OWp + (oh+ringH)*OWp + (ow+ringW),
#   zero-padded up to a multiple of 128 lanes.  Thus each conv GEMM's output
#   is directly the next conv GEMM's input (or, for the last conv with ring 0,
#   exactly PyTorch's .view(bs, -1) flatten order).
# --------------------------------------------------------------------------
def _unrolled_conv_matrix(w_np, b_np, in_hw, stride, in_pad, out_ring, k_rows):
    Cout, Cin, KH, KW = w_np.shape
    Hin, Win = in_hw
    padH, padW = in_pad
    ringH, ringW = out_ring
    s = int(stride)
    OH = (Hin + 2 * padH - KH) // s + 1
    OW = (Win + 2 * padW - KW) // s + 1
    OHp, OWp = OH + 2 * ringH, OW + 2 * ringW
    n_raw = Cout * OHp * OWp
    n_cols = _round_up(n_raw, 128)
    assert k_rows >= Cin * Hin * Win

    Wm = np.zeros((k_rows, n_cols), np.float32)
    bm = np.zeros((n_cols,), np.float32)
    ci = np.arange(Cin)
    co = np.arange(Cout)
    for oh in range(OH):
        for ow in range(OW):
            ocols = co * OHp * OWp + (oh + ringH) * OWp + (ow + ringW)
            bm[ocols] = b_np                      # bias only at real positions;
            for kh in range(KH):                  # pad ring keeps bias 0 -> ReLU(0)=0
                h = oh * s + kh - padH
                if h < 0 or h >= Hin:
                    continue
                for kw in range(KW):
                    w = ow * s + kw - padW
                    if w < 0 or w >= Win:
                        continue
                    irows = ci * Hin * Win + h * Win + w
                    Wm[np.ix_(irows, ocols)] += w_np[:, :, kh, kw].T
    return Wm, bm, (OH, OW), n_cols


# --------------------------------------------------------------------------
# Parameter init (PyTorch tensor layouts, deterministic) and the init-time
# preparation of the fused-kernel GEMM operands.
# --------------------------------------------------------------------------
def init_params(key, in_shape, in_channels, out_dim, conv_filters, post_fcn_hiddens):
    raw = {"conv": [], "linear": []}
    conv_meta = []
    shape_hw = tuple(in_shape)
    cin = in_channels
    keys = jax.random.split(key, 2 * (len(conv_filters) + len(post_fcn_hiddens) + 1))
    ki = 0
    for (cout, k, s) in conv_filters:
        padding, shape_hw = same_padding(shape_hw, k, s)
        w = 0.1 * jax.random.normal(keys[ki], (cout, cin, k, k), jnp.float32); ki += 1
        b = 0.05 * jax.random.normal(keys[ki], (cout,), jnp.float32); ki += 1
        raw["conv"].append((w, b))
        conv_meta.append((k, s, padding))
        cin = cout
    in_dim = shape_hw[0] * shape_hw[1] * cin
    for d in list(post_fcn_hiddens) + [out_dim]:
        w = 0.1 * jax.random.normal(keys[ki], (d, in_dim), jnp.float32); ki += 1
        b = 0.05 * jax.random.normal(keys[ki], (d,), jnp.float32); ki += 1
        raw["linear"].append((w, b))
        in_dim = d
    return raw, conv_meta


def prepare_fused_params(raw_params, conv_meta, in_shape, in_channels,
                         compute_dtype=jnp.bfloat16):
    """Hoist ALL layout work out of the forward path.

    Returns a list of (W_gemm[bf16, K x N], bias[f32, 1 x N]) with every K/N a
    multiple of 128 (except the first K, which equals the raw flattened input
    size).  The last layer's padded bias lanes are -1e30 so the in-kernel
    softmax assigns them exactly zero probability.
    """
    layers = []
    cur_hw = (int(in_shape[0]), int(in_shape[1]))
    cur_rows = in_channels * cur_hw[0] * cur_hw[1]
    materialized_pad = False
    n_conv = len(conv_meta)
    flat_dim = cur_rows

    for i, ((w, b), (k, s, padding)) in enumerate(zip(raw_params["conv"], conv_meta)):
        # NOTE: faithful port of the module quirk — same_padding returns
        # (pad_left, pad_top) but Conv2d(padding=...) interprets it as (padH, padW).
        padH, padW = int(padding[0]), int(padding[1])
        if materialized_pad:
            in_hw, in_pad = (cur_hw[0] + 2 * padH, cur_hw[1] + 2 * padW), (0, 0)
        else:
            in_hw, in_pad = cur_hw, (padH, padW)
        if i + 1 < n_conv:                      # fold the NEXT conv's zero padding
            nxt = conv_meta[i + 1][2]           # into this layer's output layout
            ring = (int(nxt[0]), int(nxt[1]))
        else:
            ring = (0, 0)
        Wm, bm, out_hw, n_cols = _unrolled_conv_matrix(
            np.asarray(w, np.float32), np.asarray(b, np.float32),
            in_hw, s, in_pad, ring, k_rows=cur_rows)
        layers.append((jnp.asarray(Wm, compute_dtype),
                       jnp.asarray(bm.reshape(1, -1), jnp.float32)))
        cur_hw, cur_rows, materialized_pad = out_hw, n_cols, True
        flat_dim = w.shape[0] * out_hw[0] * out_hw[1]   # Cout*OH*OW (NCHW flatten)

    n_lin = len(raw_params["linear"])
    for j, (w, b) in enumerate(raw_params["linear"]):
        w_np = np.asarray(w, np.float32)
        b_np = np.asarray(b, np.float32)
        d_out, d_in = w_np.shape
        if j == 0:
            assert d_in == flat_dim, (d_in, flat_dim)
        assert d_in <= cur_rows
        n_cols = _round_up(d_out, 128)
        is_last = j == n_lin - 1
        Wm = np.zeros((cur_rows, n_cols), np.float32)
        Wm[:d_in, :d_out] = w_np.T                       # PyTorch Linear: x @ W.T + b
        bm = np.full((n_cols,), _NEG_INF if is_last else 0.0, np.float32)
        bm[:d_out] = b_np
        layers.append((jnp.asarray(Wm, compute_dtype),
                       jnp.asarray(bm.reshape(1, -1), jnp.float32)))
        cur_rows = n_cols
    return layers


# --------------------------------------------------------------------------
# The single fused Pallas kernel: chain of (bf16 matmul -> f32 bias -> ReLU),
# final layer without ReLU, optional softmax epilogue.  All intermediates
# live in VMEM/vregs; only the (Bp, 128) probability slab is stored to HBM.
# --------------------------------------------------------------------------
def _make_fused_kernel(n_layers, actor):
    def kernel(*refs):
        x_ref, o_ref = refs[0], refs[-1]
        h = x_ref[...]                                   # (Bp, K0) f32
        for li in range(n_layers):
            w_ref = refs[1 + 2 * li]
            b_ref = refs[2 + 2 * li]
            acc = jnp.dot(h.astype(w_ref.dtype), w_ref[...],
                          preferred_element_type=jnp.float32)   # MXU, f32 accum
            acc = acc + b_ref[...]                               # f32 elementwise
            h = jnp.maximum(acc, 0.0) if li < n_layers - 1 else acc
        if actor:
            m = jnp.max(h, axis=-1, keepdims=True)
            e = jnp.exp(h - m)                    # padded logits are -1e30 -> exp = 0
            s = jnp.sum(e, axis=-1, keepdims=True)
            h = e * pl.reciprocal(s, approx=True)            # EUP reciprocal
        o_ref[...] = h                                        # lane-dense (Bp,128) store
    return kernel


@functools.partial(jax.jit, static_argnames=("out_dim", "actor"))
def conv_dense_forward(x, fused_params, out_dim, actor=True):
    if x.ndim == 3:                       # HWC -> add batch dim (module's permute path)
        x = x[None]
    elif x.ndim != 4:
        raise ValueError("Wrong input dimensionality")
    B = x.shape[0]
    # NHWC -> NCHW flatten == .view(bs, -1) order expected by the GEMM weights.
    xf = jnp.transpose(x, (0, 3, 1, 2)).reshape(B, -1).astype(jnp.float32)
    Bp = _round_up(B, 8)                  # full sublane tiles
    xf = jnp.pad(xf, ((0, Bp - B), (0, 0)))

    n_layers = len(fused_params)
    n_out_padded = fused_params[-1][0].shape[1]
    flat = []
    for Wm, bm in fused_params:
        flat += [Wm, bm]

    out = pl.pallas_call(
        _make_fused_kernel(n_layers, actor),
        out_shape=jax.ShapeDtypeStruct((Bp, n_out_padded), jnp.float32),
        in_specs=[pl.BlockSpec(memory_space=pltpu.MemorySpace.VMEM)] * (1 + 2 * n_layers),
        out_specs=pl.BlockSpec(memory_space=pltpu.MemorySpace.VMEM),
    )(xf, *flat)
    return out[:B, :out_dim]


# --------------------------------------------------------------------------
# Pure-JAX f32 reference of the PyTorch forward (for correctness checking).
# --------------------------------------------------------------------------
def reference_forward(x, raw_params, conv_meta, actor=True):
    if x.ndim == 3:
        x = jnp.transpose(x, (2, 0, 1))[None]
    else:
        x = jnp.transpose(x, (0, 3, 1, 2))
    bs = x.shape[0]
    for (w, b), (k, s, padding) in zip(raw_params["conv"], conv_meta):
        padH, padW = int(padding[0]), int(padding[1])
        x = jax.lax.conv_general_dilated(
            x, w, window_strides=(s, s),
            padding=((padH, padH), (padW, padW)),
            dimension_numbers=("NCHW", "OIHW", "NCHW"))
        x = jnp.maximum(x + b[None, :, None, None], 0.0)
    h = x.reshape(bs, -1)
    n_lin = len(raw_params["linear"])
    for i, (w, b) in enumerate(raw_params["linear"]):
        h = h @ w.T + b
        if i < n_lin - 1:
            h = jnp.maximum(h, 0.0)
    return jax.nn.softmax(h, axis=-1) if actor else h


if __name__ == "__main__":
    key = jax.random.PRNGKey(0)
    pkey, xkey = jax.random.split(key)

    in_shape = (16, 16)
    in_channels = 4
    out_dim = 6
    conv_filters = [(8, 4, 2), (16, 4, 2)]        # (channels, kernel, stride)
    post_fcn_hiddens = [32]

    raw_params, conv_meta = init_params(pkey, in_shape, in_channels, out_dim,
                                        conv_filters, post_fcn_hiddens)
    fused_params = prepare_fused_params(raw_params, conv_meta, in_shape, in_channels)

    # NHWC input, like the PyTorch forward() expects before its permute.
    x = jax.random.normal(xkey, (2, 16, 16, 4), jnp.float32)

    out = conv_dense_forward(x, fused_params, out_dim=out_dim, actor=True)
    out = jax.block_until_ready(out)

    assert out.shape == (2, out_dim), out.shape
    # Softmax rows sum to 1 (loose tol: approximate EUP reciprocal).
    np.testing.assert_allclose(np.asarray(jnp.sum(out, axis=-1)),
                               np.ones(2, np.float32), rtol=0.0, atol=1e-2)
    # Match the pure-JAX f32 reference (loose tol: bf16 MXU operands).
    ref = reference_forward(x, raw_params, conv_meta, actor=True)
    np.testing.assert_allclose(np.asarray(out), np.asarray(ref), rtol=0.0, atol=3e-2)
    print("KERNEL_OK")
</pallas_src>

<mosaic_0001>
module attributes {stable_mosaic.version = 11 : i64} {
  func.func @kernel(%arg0: memref<8x1024xf32, #tpu.memory_space<vmem>>, %arg1: memref<1024x896xbf16, #tpu.memory_space<vmem>>, %arg2: memref<1x896xf32, #tpu.memory_space<vmem>>, %arg3: memref<896x256xbf16, #tpu.memory_space<vmem>>, %arg4: memref<1x256xf32, #tpu.memory_space<vmem>>, %arg5: memref<256x128xbf16, #tpu.memory_space<vmem>>, %arg6: memref<1x128xf32, #tpu.memory_space<vmem>>, %arg7: memref<128x128xbf16, #tpu.memory_space<vmem>>, %arg8: memref<1x128xf32, #tpu.memory_space<vmem>>, %arg9: memref<8x128xf32, #tpu.memory_space<vmem>>) attributes {dimension_semantics = [], scalar_prefetch = 0 : i64, scratch_operands = 0 : i64, tpu.core_type = #tpu.core_type<tc>} {
    %c0 = arith.constant 0 : index
    %c0_0 = arith.constant 0 : index
    %0 = vector.load %arg0[%c0, %c0_0] : memref<8x1024xf32, #tpu.memory_space<vmem>>, vector<8x1024xf32>
    %1 = arith.truncf %0 : vector<8x1024xf32> to vector<8x1024xbf16>
    %c0_1 = arith.constant 0 : index
    %c0_2 = arith.constant 0 : index
    %2 = vector.load %arg1[%c0_1, %c0_2] : memref<1024x896xbf16, #tpu.memory_space<vmem>>, vector<1024x896xbf16>
    %cst = arith.constant dense<0.000000e+00> : vector<8x896xf32>
    %3 = tpu.matmul %1, %2, %cst {dimension_numbers = #tpu.dot_dimension_numbers<[1], [0], [0], [1], [0, 0, 1, 1], [], []>} : vector<8x1024xbf16>, vector<1024x896xbf16>, vector<8x896xf32> -> vector<8x896xf32>
    %c0_3 = arith.constant 0 : index
    %c0_4 = arith.constant 0 : index
    %4 = vector.load %arg2[%c0_3, %c0_4] : memref<1x896xf32, #tpu.memory_space<vmem>>, vector<1x896xf32>
    %5 = vector.broadcast %4 : vector<1x896xf32> to vector<8x896xf32>
    %6 = arith.addf %3, %5 : vector<8x896xf32>
    %cst_5 = arith.constant 0.000000e+00 : f32
    %7 = vector.broadcast %cst_5 : f32 to vector<8x896xf32>
    %8 = arith.maximumf %6, %7 : vector<8x896xf32>
    %9 = arith.truncf %8 : vector<8x896xf32> to vector<8x896xbf16>
    %c0_6 = arith.constant 0 : index
    %c0_7 = arith.constant 0 : index
    %10 = vector.load %arg3[%c0_6, %c0_7] : memref<896x256xbf16, #tpu.memory_space<vmem>>, vector<896x256xbf16>
    %cst_8 = arith.constant dense<0.000000e+00> : vector<8x256xf32>
    %11 = tpu.matmul %9, %10, %cst_8 {dimension_numbers = #tpu.dot_dimension_numbers<[1], [0], [0], [1], [0, 0, 1, 1], [], []>} : vector<8x896xbf16>, vector<896x256xbf16>, vector<8x256xf32> -> vector<8x256xf32>
    %c0_9 = arith.constant 0 : index
    %c0_10 = arith.constant 0 : index
    %12 = vector.load %arg4[%c0_9, %c0_10] : memref<1x256xf32, #tpu.memory_space<vmem>>, vector<1x256xf32>
    %13 = vector.broadcast %12 : vector<1x256xf32> to vector<8x256xf32>
    %14 = arith.addf %11, %13 : vector<8x256xf32>
    %cst_11 = arith.constant 0.000000e+00 : f32
    %15 = vector.broadcast %cst_11 : f32 to vector<8x256xf32>
    %16 = arith.maximumf %14, %15 : vector<8x256xf32>
    %17 = arith.truncf %16 : vector<8x256xf32> to vector<8x256xbf16>
    %c0_12 = arith.constant 0 : index
    %c0_13 = arith.constant 0 : index
    %18 = vector.load %arg5[%c0_12, %c0_13] : memref<256x128xbf16, #tpu.memory_space<vmem>>, vector<256x128xbf16>
    %cst_14 = arith.constant dense<0.000000e+00> : vector<8x128xf32>
    %19 = tpu.matmul %17, %18, %cst_14 {dimension_numbers = #tpu.dot_dimension_numbers<[1], [0], [0], [1], [0, 0, 1, 1], [], []>} : vector<8x256xbf16>, vector<256x128xbf16>, vector<8x128xf32> -> vector<8x128xf32>
    %c0_15 = arith.constant 0 : index
    %c0_16 = arith.constant 0 : index
    %20 = vector.load %arg6[%c0_15, %c0_16] : memref<1x128xf32, #tpu.memory_space<vmem>>, vector<1x128xf32>
    %21 = vector.broadcast %20 : vector<1x128xf32> to vector<8x128xf32>
    %22 = arith.addf %19, %21 : vector<8x128xf32>
    %cst_17 = arith.constant 0.000000e+00 : f32
    %23 = vector.broadcast %cst_17 : f32 to vector<8x128xf32>
    %24 = arith.maximumf %22, %23 : vector<8x128xf32>
    %25 = arith.truncf %24 : vector<8x128xf32> to vector<8x128xbf16>
    %c0_18 = arith.constant 0 : index
    %c0_19 = arith.constant 0 : index
    %26 = vector.load %arg7[%c0_18, %c0_19] : memref<128x128xbf16, #tpu.memory_space<vmem>>, vector<128x128xbf16>
    %cst_20 = arith.constant dense<0.000000e+00> : vector<8x128xf32>
    %27 = tpu.matmul %25, %26, %cst_20 {dimension_numbers = #tpu.dot_dimension_numbers<[1], [0], [0], [1], [0, 0, 1, 1], [], []>} : vector<8x128xbf16>, vector<128x128xbf16>, vector<8x128xf32> -> vector<8x128xf32>
    %c0_21 = arith.constant 0 : index
    %c0_22 = arith.constant 0 : index
    %28 = vector.load %arg8[%c0_21, %c0_22] : memref<1x128xf32, #tpu.memory_space<vmem>>, vector<1x128xf32>
    %29 = vector.broadcast %28 : vector<1x128xf32> to vector<8x128xf32>
    %30 = arith.addf %27, %29 : vector<8x128xf32>
    %cst_23 = arith.constant dense<0xFF800000> : vector<8xf32>
    %31 = vector.multi_reduction <maximumf>, %30, %cst_23 [1] : vector<8x128xf32> to vector<8xf32>
    %32 = vector.shape_cast %31 : vector<8xf32> to vector<8x1xf32>
    %33 = vector.broadcast %32 : vector<8x1xf32> to vector<8x128xf32>
    %34 = arith.subf %30, %33 : vector<8x128xf32>
    %35 = math.exp %34 : vector<8x128xf32>
    %cst_24 = arith.constant dense<0.000000e+00> : vector<8xf32>
    %36 = vector.multi_reduction <add>, %35, %cst_24 [1] : vector<8x128xf32> to vector<8xf32>
    %37 = vector.shape_cast %36 : vector<8xf32> to vector<8x1xf32>
    %38 = tpu.reciprocal %37 {approx = true} : vector<8x1xf32> -> vector<8x1xf32>
    %39 = vector.broadcast %38 : vector<8x1xf32> to vector<8x128xf32>
    %40 = arith.mulf %35, %39 : vector<8x128xf32>
    %c0_25 = arith.constant 0 : index
    %c0_26 = arith.constant 0 : index
    %41 = vector.load %arg9[%c0_25, %c0_26] : memref<8x128xf32, #tpu.memory_space<vmem>>, vector<8x128xf32>
    tpu.vector_store %arg9[%c0_25, %c0_26], %40 {strides = array<i32>} : memref<8x128xf32, #tpu.memory_space<vmem>>, vector<8x128xf32>,
    return
  }
}

</mosaic_0001>

<bundles_post_ra>
// kernel: conv_dense_forward.1
= control target key start
LH: loop header
LB: loop body
LE: loop exit
PB: predicated region body
PF: predicated region fallthrough
CT: control target
= control target key end

     0   :  { %14 = vsyncpa [#allocation3], 0  ;;  %s6925_s0 = inlined_call_operand.vmem [shape: f32[8,1024], index: 0, kind: input, shape index: {}]   ;;  %s6926_s1 = inlined_call_operand.hbm [shape: bf16[1024,896], index: 1, kind: input, shape index: {}]   ;;  %s6927_s2 = inlined_call_operand.hbm [shape: f32[1,896], index: 2, kind: input, shape index: {}]   ;;  %s6928_s3 = inlined_call_operand.hbm [shape: bf16[896,256], index: 3, kind: input, shape index: {}]   ;;  %s6929_s4 = inlined_call_operand.hbm [shape: f32[1,256], index: 4, kind: input, shape index: {}]   ;;  %s6930_s5 = inlined_call_operand.hbm [shape: bf16[256,128], index: 5, kind: input, shape index: {}]   ;;  %s6931_s6 = inlined_call_operand.hbm [shape: f32[1,128], index: 6, kind: input, shape index: {}]   ;;  %s6932_s7 = inlined_call_operand.hbm [shape: bf16[128,128], index: 7, kind: input, shape index: {}]   ;;  %s6933_s8 = inlined_call_operand.hbm [shape: f32[1,128], index: 8, kind: input, shape index: {}]   ;;  %s6934_s9 = inlined_call_operand.vmem [shape: f32[8,128], index: 9, kind: output, shape index: {}]  }
   0x1   :  { %15 = vsyncpa [#allocation5], 0 }
   0x2   :  { %16 = vsyncpa [#allocation8], 0 }
   0x3   :  { %17 = vsyncpa [#allocation11], 0 }
   0x4   :  { %18 = vsyncpa [#allocation14], 0  ;;  %s6648_s30 = smov [#allocation4]   ;;  %s6649_s11 = smov [#allocation7]  }
   0x5   :  { %s39_s10 = sshll.u32 %s6648_s30, 4  ;;  %s61_s12 = sshll.u32 %s6649_s11, 4  ;;  %s40_s10 = int_to_ptr.vmem [resolvable:$true] %s39_s10  ;;  %s62_s12 = int_to_ptr.vmem [resolvable:$true] %s61_s12 }
   0x6   :  { %s6462_s15 = scalar_lea.hbm %s6927_s2, 112 }
   0x7   :  { %p6463_p0 = scmp.ne.s32.totalorder %s6927_s2, %s6462_s15  ;;  %p6466_p1 = scmp.lt.u32.totalorder %s6462_s15, %s6927_s2 }
   0x9   :  { %p6468_p2 = pnand %p6466_p1, %p6463_p0 }
   0xb   :  { %6471 = shalt.err (!%p6468_p2)
}
   0xc   :  { %s6472_s20 = scalar_lea.vmem %s40_s10, 112  ;;  %s6476_s21 = scalar_lea.vmem %s40_s10, 128 }
   0xd   :  { %p6473_p3 = scmp.ne.s32.totalorder %s40_s10, %s6472_s20  ;;  %p6477_p4 = scmp.lt.s32.totalorder %s40_s10, %s40_s10 }
   0xe   :  { %p6478_p5 = scmp.lt.s32.totalorder %s6476_s21, %s6472_s20 }
  0x10   :  { %p6479_p6 = por %p6478_p5, %p6477_p4 }
  0x12   :  { %p6480_p7 = pnand %p6479_p6, %p6473_p3 }
  0x14   :  { %6483 = shalt.err (!%p6480_p7)
}
  0x15   :  { %42 = dma.hbm_to_vmem [thread:$0]  %s6927_s2, 112, %s40_s10, [#allocation5]  }
  0x16   :  { %s6484_s26 = scalar_lea.hbm %s6929_s4, 32 }
  0x17   :  { %p6485_p8 = scmp.ne.s32.totalorder %s6929_s4, %s6484_s26  ;;  %p6488_p9 = scmp.lt.u32.totalorder %s6484_s26, %s6929_s4 }
  0x19   :  { %p6490_p10 = pnand %p6488_p9, %p6485_p8 }
  0x1b   :  { %6493 = shalt.err (!%p6490_p10)
}
  0x1c   :  { %s6494_s11 = scalar_lea.vmem %s62_s12, 32  ;;  %p6499_p12 = scmp.lt.s32.totalorder %s62_s12, %s62_s12 }
  0x1d   :  { %p6495_p11 = scmp.ne.s32.totalorder %s62_s12, %s6494_s11  ;;  %p6500_p13 = scmp.lt.s32.totalorder %s6494_s11, %s6494_s11 }
  0x1f   :  { %p6501_p0 = por %p6500_p13, %p6499_p12 }
  0x21   :  { %p6502_p1 = pnand %p6501_p0, %p6495_p11 }
  0x23   :  { %6505 = shalt.err (!%p6502_p1)
}
  0x24   :  { %64 = dma.hbm_to_vmem [thread:$0]  %s6929_s4, 32, %s62_s12, [#allocation8]  }
  0x25   :  { %s6650_s13 = smov [#allocation10]   ;;  %s6651_s15 = smov [#allocation2]  }
  0x26   :  { %s83_s14 = sshll.u32 %s6650_s13, 4  ;;  %s26_s16 = sshll.u32 %s6651_s15, 4  ;;  %s84_s14 = int_to_ptr.vmem [resolvable:$true] %s83_s14  ;;  %s6739_s16 = int_to_ptr.vmem [resolvable:$true] %s26_s16 }
  0x27   :  { %s6506_s19 = scalar_lea.hbm %s6931_s6, 16 }
  0x28   :  { %p6507_p2 = scmp.ne.s32.totalorder %s6931_s6, %s6506_s19  ;;  %p6510_p3 = scmp.lt.u32.totalorder %s6506_s19, %s6931_s6 }
  0x2a   :  { %p6512_p4 = pnand %p6510_p3, %p6507_p2 }
  0x2c   :  { %6515 = shalt.err (!%p6512_p4)
}
  0x2d   :  { %s6516_s4 = scalar_lea.vmem %s84_s14, 16  ;;  %s6520_s12 = scalar_lea.vmem %s84_s14, 32 }
  0x2e   :  { %p6517_p5 = scmp.ne.s32.totalorder %s84_s14, %s6516_s4  ;;  %p6521_p6 = scmp.lt.s32.totalorder %s84_s14, %s84_s14 }
  0x2f   :  { %p6522_p7 = scmp.lt.s32.totalorder %s6520_s12, %s6516_s4 }
  0x31   :  { %p6523_p8 = por %p6522_p7, %p6521_p6 }
  0x33   :  { %p6524_p9 = pnand %p6523_p8, %p6517_p5 }
  0x35   :  { %6527 = shalt.err (!%p6524_p9)
}
  0x36   :  { %86 = dma.hbm_to_vmem [thread:$0]  %s6931_s6, 16, %s84_s14, [#allocation11]  }
  0x37   :  { %s6528_s28 = scalar_lea.hbm %s6926_s1, 57344 }
  0x38   :  { %p6529_p10 = scmp.ne.s32.totalorder %s6926_s1, %s6528_s28  ;;  %p6532_p11 = scmp.lt.u32.totalorder %s6528_s28, %s6926_s1 }
  0x3a   :  { %p6534_p12 = pnand %p6532_p11, %p6529_p10 }
  0x3c   :  { %6537 = shalt.err (!%p6534_p12)
}
  0x3d   :  { %s6538_s10 = scalar_lea.vmem %s6739_s16, 57344  ;;  %p6543_p0 = scmp.lt.s32.totalorder %s6739_s16, %s6739_s16 }
  0x3e   :  { %p6539_p13 = scmp.ne.s32.totalorder %s6739_s16, %s6538_s10  ;;  %p6544_p1 = scmp.lt.s32.totalorder %s6538_s10, %s6538_s10 }
  0x40   :  { %p6545_p2 = por %p6544_p1, %p6543_p0 }
  0x42   :  { %p6546_p3 = pnand %p6545_p2, %p6539_p13 }
  0x44   :  { %6549 = shalt.err (!%p6546_p3)
}
  0x45   :  { %s6652_s6 = smov 448   ;;  %s6653_s13 = smov 28  }
  0x46   :  { %32 = dma.hbm_to_vmem [thread:$0]  %s6926_s1, 57344, %s6739_s16, [#allocation3], %s6652_s6, %s6652_s6, %s6653_s13  }
  0x47   :  { %s6654_s17 = smov [#allocation6]   ;;  %s6550_s21 = scalar_lea.hbm %s6928_s3, 14336 }
  0x48   :  { %s48_s18 = sshll.u32 %s6654_s17, 4  ;;  %p6551_p4 = scmp.ne.s32.totalorder %s6928_s3, %s6550_s21  ;;  %s49_s18 = int_to_ptr.vmem [resolvable:$true] %s48_s18 }
  0x49   :  { %p6554_p5 = scmp.lt.u32.totalorder %s6550_s21, %s6928_s3 }
  0x4b   :  { %p6556_p6 = pnand %p6554_p5, %p6551_p4 }
  0x4d   :  { %6559 = shalt.err (!%p6556_p6)
}
  0x4e   :  { %s6560_s24 = scalar_lea.vmem %s49_s18, 14336  ;;  %p6565_p8 = scmp.lt.s32.totalorder %s49_s18, %s49_s18 }
  0x4f   :  { %p6561_p7 = scmp.ne.s32.totalorder %s49_s18, %s6560_s24  ;;  %p6566_p9 = scmp.lt.s32.totalorder %s6560_s24, %s6560_s24 }
  0x51   :  { %p6567_p10 = por %p6566_p9, %p6565_p8 }
  0x53   :  { %p6568_p11 = pnand %p6567_p10, %p6561_p7 }
  0x55   :  { %6571 = shalt.err (!%p6568_p11)
}
  0x56   :  { %s6655_s1 = smov 128   ;;  %s6656_s16 = smov 8  }
  0x57   :  { %54 = dma.hbm_to_vmem [thread:$0]  %s6928_s3, 14336, %s49_s18, [#allocation5], %s6655_s1, %s6655_s1, %s6656_s16  }
  0x58   :  { %s6657_s27 = smov [#allocation9]   ;;  %s6572_s11 = scalar_lea.hbm %s6930_s5, 2048 }
  0x59   :  { %s70_s28 = sshll.u32 %s6657_s27, 4  ;;  %p6573_p12 = scmp.ne.s32.totalorder %s6930_s5, %s6572_s11  ;;  %s71_s28 = int_to_ptr.vmem [resolvable:$true] %s70_s28 }
  0x5a   :  { %p6576_p13 = scmp.lt.u32.totalorder %s6572_s11, %s6930_s5 }
  0x5c   :  { %p6578_p0 = pnand %p6576_p13, %p6573_p12 }
  0x5e   :  { %6581 = shalt.err (!%p6578_p0)
}
  0x5f   :  { %s6582_s14 = scalar_lea.vmem %s71_s28, 2048  ;;  %p6587_p2 = scmp.lt.s32.totalorder %s71_s28, %s71_s28 }
  0x60   :  { %p6583_p1 = scmp.ne.s32.totalorder %s71_s28, %s6582_s14  ;;  %p6588_p3 = scmp.lt.s32.totalorder %s6582_s14, %s6582_s14 }
  0x62   :  { %p6589_p4 = por %p6588_p3, %p6587_p2 }
  0x64   :  { %p6590_p5 = pnand %p6589_p4, %p6583_p1 }
  0x66   :  { %6593 = shalt.err (!%p6590_p5)
}
  0x67   :  { %s6658_s3 = smov 64   ;;  %s6659_s15 = smov 4  }
  0x68   :  { %76 = dma.hbm_to_vmem [thread:$0]  %s6930_s5, 2048, %s71_s28, [#allocation8], %s6658_s3, %s6658_s3, %s6659_s15  }
  0x69   :  { %s6660_s19 = smov [#allocation12]   ;;  %s6661_s21 = smov [#allocation13]  }
  0x6a   :  { %s92_s20 = sshll.u32 %s6660_s19, 4  ;;  %s105_s22 = sshll.u32 %s6661_s21, 4  ;;  %s93_s20 = int_to_ptr.vmem [resolvable:$true] %s92_s20  ;;  %s106_s22 = int_to_ptr.vmem [resolvable:$true] %s105_s22 }
  0x6b   :  { %s6594_s12 = scalar_lea.hbm %s6932_s7, 1024 }
  0x6c   :  { %p6595_p6 = scmp.ne.s32.totalorder %s6932_s7, %s6594_s12  ;;  %p6598_p7 = scmp.lt.u32.totalorder %s6594_s12, %s6932_s7 }
  0x6e   :  { %p6600_p8 = pnand %p6598_p7, %p6595_p6 }
  0x70   :  { %6603 = shalt.err (!%p6600_p8)
}
  0x71   :  { %s6604_s5 = scalar_lea.vmem %s93_s20, 1024  ;;  %p6609_p10 = scmp.lt.s32.totalorder %s93_s20, %s93_s20 }
  0x72   :  { %p6605_p9 = scmp.ne.s32.totalorder %s93_s20, %s6604_s5  ;;  %p6610_p11 = scmp.lt.s32.totalorder %s6604_s5, %s6604_s5 }
  0x74   :  { %p6611_p12 = por %p6610_p11, %p6609_p10 }
  0x76   :  { %p6612_p13 = pnand %p6611_p12, %p6605_p9 }
  0x78   :  { %6615 = shalt.err (!%p6612_p13)
}
  0x79   :  { %98 = dma.hbm_to_vmem [thread:$0]  %s6932_s7, 1024, %s93_s20, [#allocation11], %s6658_s3, %s6658_s3, %s6659_s15  }
  0x7a   :  { %s6616_s30 = scalar_lea.hbm %s6933_s8, 16 }
  0x7b   :  { %p6617_p0 = scmp.ne.s32.totalorder %s6933_s8, %s6616_s30  ;;  %p6620_p1 = scmp.lt.u32.totalorder %s6616_s30, %s6933_s8 }
  0x7d   :  { %p6622_p2 = pnand %p6620_p1, %p6617_p0 }
  0x7f   :  { %6625 = shalt.err (!%p6622_p2)
}
  0x80   :  { %s6626_s13 = scalar_lea.vmem %s106_s22, 16  ;;  %s6630_s14 = scalar_lea.vmem %s106_s22, 32 }
  0x81   :  { %p6627_p3 = scmp.ne.s32.totalorder %s106_s22, %s6626_s13  ;;  %p6631_p4 = scmp.lt.s32.totalorder %s106_s22, %s106_s22 }
  0x82   :  { %p6632_p5 = scmp.lt.s32.totalorder %s6630_s14, %s6626_s13 }
  0x84   :  { %p6633_p6 = por %p6632_p5, %p6631_p4 }
  0x86   :  { %p6634_p7 = pnand %p6633_p6, %p6627_p3 }
  0x88   :  { %6637 = shalt.err (!%p6634_p7)
}
  0x89   :  { %108 = dma.hbm_to_vmem [thread:$0]  %s6933_s8, 16, %s106_s22, [#allocation14]  }
  0x8a   :  { %6638 = dma.done.wait [#allocation3], 57344  }
  0x8b   :  { %6639 = vsyncadd [#allocation3], 4294909952 }
  0x8c   :  { %6640 = dma.done.wait [#allocation5], 14448  }
  0x8d   :  { %6641 = vsyncadd [#allocation5], 4294952848 }
  0x8e   :  { %6642 = dma.done.wait [#allocation8], 2080  }
  0x8f   :  { %6643 = vsyncadd [#allocation8], 4294965216 }
  0x90   :  { %6644 = dma.done.wait [#allocation11], 1040  }
  0x91   :  { %6645 = vsyncadd [#allocation11], 4294966256 }
  0x92   :  { %6646 = dma.done.wait [#allocation14], 16  }
  0x93   :  { %6647 = vsyncadd [#allocation14], 4294967280  ;;  %v5626_v0 = vld [vmem:[#allocation2 + $0x4] ss:$28 sps:$4 sm:$0xff]   ;;  %v5628_v1 = vld [vmem:[#allocation2 + $0xc] ss:$28 sps:$4 sm:$0xff]  }
  0x94   :  { %3003 = vmatprep.subr.bf16.mxu0 %v5626_v0  ;;  %v5630_v2 = vld [vmem:[#allocation2] ss:$28 sps:$4 sm:$0xff]   ;;  %v5631_v3 = vld [vmem:[#allocation2 + $0x8] ss:$28 sps:$4 sm:$0xff]   ;;  %3167 = vmatprep.subr.bf16.mxu1 %v5628_v1  ;;  %v5636_v6 = vld [vmem:[#allocation2 + $0x38] ss:$28 sps:$4 sm:$0xff]  }
  0x95   :  { %v5632_v4 = vld [vmem:[#allocation2 + $0x3c] ss:$28 sps:$4 sm:$0xff]   ;;  %3004 = vmatpush1.bf16.msra.mxu0 %v5630_v2  ;;  %3168 = vmatpush1.bf16.msra.mxu1 %v5631_v3  ;;  %v5634_v5 = vld [vmem:[#allocation2 + $0x44] ss:$28 sps:$4 sm:$0xff]   ;;  %v5638_v8 = vld [vmem:[#allocation2 + $0x74] ss:$28 sps:$4 sm:$0xff]  }
  0x96   :  { %3005 = vmatprep.subr.bf16.mxu0 %v5632_v4  ;;  %v5637_v7 = vld [vmem:[#allocation2 + $0x40] ss:$28 sps:$4 sm:$0xff]   ;;  %3169 = vmatprep.subr.bf16.mxu1 %v5634_v5  ;;  %v5642_v10 = vld [vmem:[#allocation2 + $0x70] ss:$28 sps:$4 sm:$0xff]   ;;  %v5643_v11 = vld [vmem:[#allocation2 + $0x78] ss:$28 sps:$4 sm:$0xff]  }
  0x97   :  { %v5640_v9 = vld [vmem:[#allocation2 + $0x7c] ss:$28 sps:$4 sm:$0xff]   ;;  %v5644_v12 = vld [vmem:[#allocation2 + $0xac] ss:$28 sps:$4 sm:$0xff]   ;;  %v5646_v13 = vld [vmem:[#allocation2 + $0xb4] ss:$28 sps:$4 sm:$0xff]  }
  0x98   :  { %v5648_v14 = vld [vmem:[#allocation2 + $0xa8] ss:$28 sps:$4 sm:$0xff]   ;;  %v5649_v15 = vld [vmem:[#allocation2 + $0xb0] ss:$28 sps:$4 sm:$0xff]   ;;  %v5654_v18 = vld [vmem:[#allocation2 + $0xe0] ss:$28 sps:$4 sm:$0xff]  }
  0x99   :  { %3006 = vmatpush1.bf16.msra.mxu0 %v5636_v6  ;;  %3170 = vmatpush1.bf16.msra.mxu1 %v5637_v7  ;;  %v5650_v16 = vld [vmem:[#allocation2 + $0xe4] ss:$28 sps:$4 sm:$0xff]   ;;  %v5652_v17 = vld [vmem:[#allocation2 + $0xec] ss:$28 sps:$4 sm:$0xff]   ;;  %v5656_v20 = vld [vmem:[#allocation2 + $0x11c] ss:$28 sps:$4 sm:$0xff]  }
  0x9a   :  { %3007 = vmatprep.subr.bf16.mxu0 %v5638_v8  ;;  %3171 = vmatprep.subr.bf16.mxu1 %v5640_v9  ;;  %v5655_v19 = vld [vmem:[#allocation2 + $0xe8] ss:$28 sps:$4 sm:$0xff]   ;;  %v5660_v22 = vld [vmem:[#allocation2 + $0x118] ss:$28 sps:$4 sm:$0xff]   ;;  %v5661_v23 = vld [vmem:[#allocation2 + $0x120] ss:$28 sps:$4 sm:$0xff]  }
  0x9b   :  { %v5658_v21 = vld [vmem:[#allocation2 + $0x124] ss:$28 sps:$4 sm:$0xff]   ;;  %v5662_v24 = vld [vmem:[#allocation2 + $0x154] ss:$28 sps:$4 sm:$0xff]   ;;  %v5664_v25 = vld [vmem:[#allocation2 + $0x15c] ss:$28 sps:$4 sm:$0xff]  }
  0x9c   :  { %v5666_v26 = vld [vmem:[#allocation2 + $0x150] ss:$28 sps:$4 sm:$0xff]   ;;  %v5667_v27 = vld [vmem:[#allocation2 + $0x158] ss:$28 sps:$4 sm:$0xff]   ;;  %v5672_v30 = vld [vmem:[#allocation2 + $0x188] ss:$28 sps:$4 sm:$0xff]  }
  0x9d   :  { %3008 = vmatpush1.bf16.msra.mxu0 %v5642_v10  ;;  %3172 = vmatpush1.bf16.msra.mxu1 %v5643_v11  ;;  %v5668_v28 = vld [vmem:[#allocation2 + $0x18c] ss:$28 sps:$4 sm:$0xff]   ;;  %v5670_v29 = vld [vmem:[#allocation2 + $0x194] ss:$28 sps:$4 sm:$0xff]   ;;  %v5674_v32 = vld [vmem:[#allocation2 + $0x1c4] ss:$28 sps:$4 sm:$0xff]  }
  0x9e   :  { %3009 = vmatprep.subr.bf16.mxu0 %v5644_v12  ;;  %3173 = vmatprep.subr.bf16.mxu1 %v5646_v13  ;;  %v5673_v31 = vld [vmem:[#allocation2 + $0x190] ss:$28 sps:$4 sm:$0xff]   ;;  %v5678_v34 = vld [vmem:[#allocation2 + $0x1c0] ss:$28 sps:$4 sm:$0xff]   ;;  %v5679_v35 = vld [vmem:[#allocation2 + $0x1c8] ss:$28 sps:$4 sm:$0xff]  }
  0x9f   :  { %v5676_v33 = vld [vmem:[#allocation2 + $0x1cc] ss:$28 sps:$4 sm:$0xff]   ;;  %v5680_v36 = vld [vmem:[#allocation2 + $0x1fc] ss:$28 sps:$4 sm:$0xff]   ;;  %v5682_v37 = vld [vmem:[#allocation2 + $0x204] ss:$28 sps:$4 sm:$0xff]  }
  0xa0   :  { %v5684_v38 = vld [vmem:[#allocation2 + $0x1f8] ss:$28 sps:$4 sm:$0xff]   ;;  %v5685_v39 = vld [vmem:[#allocation2 + $0x200] ss:$28 sps:$4 sm:$0xff]   ;;  %v5690_v42 = vld [vmem:[#allocation2 + $0x230] ss:$28 sps:$4 sm:$0xff]  }
  0xa1   :  { %3010 = vmatpush1.bf16.msra.mxu0 %v5648_v14  ;;  %3174 = vmatpush1.bf16.msra.mxu1 %v5649_v15  ;;  %v5686_v40 = vld [vmem:[#allocation2 + $0x234] ss:$28 sps:$4 sm:$0xff]   ;;  %v5688_v41 = vld [vmem:[#allocation2 + $0x23c] ss:$28 sps:$4 sm:$0xff]   ;;  %v5692_v44 = vld [vmem:[#allocation2 + $0x26c] ss:$28 sps:$4 sm:$0xff]  }
  0xa2   :  { %3011 = vmatprep.subr.bf16.mxu0 %v5650_v16  ;;  %3175 = vmatprep.subr.bf16.mxu1 %v5652_v17  ;;  %v5691_v43 = vld [vmem:[#allocation2 + $0x238] ss:$28 sps:$4 sm:$0xff]   ;;  %v135_v46 = vld [vmem:[%s6925_s0 + $0x8] sm:$0xff]  ;;  %v5698_v50 = vld [vmem:[#allocation2 + $0x2a4] ss:$28 sps:$4 sm:$0xff]   ;;  %vm6664_vm0 = vmmov 0  }
  0xa3   :  { %v5694_v45 = vld [vmem:[#allocation2 + $0x274] ss:$28 sps:$4 sm:$0xff]   ;;  %v5696_v47 = vld [vmem:[#allocation2 + $0x268] ss:$28 sps:$4 sm:$0xff]   ;;  %v6821_v48 = vpack.c.bf16 %v135_v46, %v135_v46  ;;  %v5702_v52 = vld [vmem:[#allocation2 + $0x2a0] ss:$28 sps:$4 sm:$0xff]  }
  0xa4   :  { %v5697_v49 = vld [vmem:[#allocation2 + $0x270] ss:$28 sps:$4 sm:$0xff]   ;;  %v5703_v53 = vld [vmem:[#allocation2 + $0x2a8] ss:$28 sps:$4 sm:$0xff]   ;;  %v5704_v54 = vld [vmem:[#allocation2 + $0x2dc] ss:$28 sps:$4 sm:$0xff]  }
  0xa5   :  { %3012 = vmatpush1.bf16.msra.mxu0 %v5654_v18  ;;  %3176 = vmatpush1.bf16.msra.mxu1 %v5655_v19  ;;  %v5700_v51 = vld [vmem:[#allocation2 + $0x2ac] ss:$28 sps:$4 sm:$0xff]   ;;  %v5706_v55 = vld [vmem:[#allocation2 + $0x2e4] ss:$28 sps:$4 sm:$0xff]   ;;  %v5708_v56 = vld [vmem:[#allocation2 + $0x2d8] ss:$28 sps:$4 sm:$0xff]  }
  0xa6   :  { %3013 = vmatprep.subr.bf16.mxu0 %v5656_v20  ;;  %3177 = vmatprep.subr.bf16.mxu1 %v5658_v21  ;;  %v5709_v57 = vld [vmem:[#allocation2 + $0x2e0] ss:$28 sps:$4 sm:$0xff]   ;;  %v5710_v58 = vld [vmem:[#allocation2 + $0x314] ss:$28 sps:$4 sm:$0xff]   ;;  %v5716_v62 = vld [vmem:[#allocation2 + $0x34c] ss:$28 sps:$4 sm:$0xff]  }
  0xa7   :  { %3035 = vmatprep.mubr.bf16.mxu0 %v6821_v48  ;;  %3199 = vmatprep.mubr.bf16.mxu1 %v6821_v48  ;;  %v5712_v59 = vld [vmem:[#allocation2 + $0x31c] ss:$28 sps:$4 sm:$0xff]   ;;  %v5714_v60 = vld [vmem:[#allocation2 + $0x310] ss:$28 sps:$4 sm:$0xff]   ;;  %v5720_v0 = vld [vmem:[#allocation2 + $0x348] ss:$28 sps:$4 sm:$0xff]  }
  0xa8   :  { %v5715_v61 = vld [vmem:[#allocation2 + $0x318] ss:$28 sps:$4 sm:$0xff]   ;;  %v5721_v1 = vld [vmem:[#allocation2 + $0x350] ss:$28 sps:$4 sm:$0xff]   ;;  %v134_v2 = vld [vmem:[%s6925_s0] sm:$0xff] }
  0xa9   :  { %3014 = vmatpush1.bf16.msra.mxu0 %v5660_v22  ;;  %3178 = vmatpush1.bf16.msra.mxu1 %v5661_v23  ;;  %v5718_v63 = vld [vmem:[#allocation2 + $0x354] ss:$28 sps:$4 sm:$0xff]   ;;  %v5724_v3 = vld [vmem:[#allocation2 + $0x384] ss:$28 sps:$4 sm:$0xff]   ;;  %v5727_v4 = vld [vmem:[#allocation2 + $0x38c] ss:$28 sps:$4 sm:$0xff]   ;;  %v6828_v5 = vpack.c.bf16 %v134_v2, %v134_v2 }
  0xaa   :  { %3015 = vmatprep.subr.bf16.mxu0 %v5662_v24  ;;  %3179 = vmatprep.subr.bf16.mxu1 %v5664_v25  ;;  %v5722_v6 = vld [vmem:[#allocation2 + $0x380] ss:$28 sps:$4 sm:$0xff]   ;;  %v5725_v7 = vld [vmem:[#allocation2 + $0x388] ss:$28 sps:$4 sm:$0xff]   ;;  %v5728_v10 = vld [vmem:[#allocation2 + $0x3b8] ss:$28 sps:$4 sm:$0xff]  }
  0xab   :  { %v5730_v8 = vld [vmem:[#allocation2 + $0x3bc] ss:$28 sps:$4 sm:$0xff]   ;;  %v5733_v9 = vld [vmem:[#allocation2 + $0x3c4] ss:$28 sps:$4 sm:$0xff]   ;;  %v5736_v12 = vld [vmem:[#allocation2 + $0x3f4] ss:$28 sps:$4 sm:$0xff]  }
  0xac   :  { %v5731_v11 = vld [vmem:[#allocation2 + $0x3c0] ss:$28 sps:$4 sm:$0xff]   ;;  %v5734_v14 = vld [vmem:[#allocation2 + $0x3f0] ss:$28 sps:$4 sm:$0xff]   ;;  %v5737_v15 = vld [vmem:[#allocation2 + $0x3f8] ss:$28 sps:$4 sm:$0xff]  }
  0xad   :  { %3016 = vmatpush1.bf16.msra.mxu0 %v5666_v26  ;;  %3180 = vmatpush1.bf16.msra.mxu1 %v5667_v27  ;;  %v5739_v13 = vld [vmem:[#allocation2 + $0x3fc] ss:$28 sps:$4 sm:$0xff]   ;;  %v5742_v16 = vld [vmem:[#allocation2 + $0x42c] ss:$28 sps:$4 sm:$0xff]   ;;  %v5745_v17 = vld [vmem:[#allocation2 + $0x434] ss:$28 sps:$4 sm:$0xff]  }
  0xae   :  { %3017 = vmatprep.subr.bf16.mxu0 %v5668_v28  ;;  %3181 = vmatprep.subr.bf16.mxu1 %v5670_v29  ;;  %v5740_v18 = vld [vmem:[#allocation2 + $0x428] ss:$28 sps:$4 sm:$0xff]   ;;  %v5743_v19 = vld [vmem:[#allocation2 + $0x430] ss:$28 sps:$4 sm:$0xff]   ;;  %v5746_v22 = vld [vmem:[#allocation2 + $0x460] ss:$28 sps:$4 sm:$0xff]  }
  0xaf   :  { %v5748_v20 = vld [vmem:[#allocation2 + $0x464] ss:$28 sps:$4 sm:$0xff]   ;;  %v5751_v21 = vld [vmem:[#allocation2 + $0x46c] ss:$28 sps:$4 sm:$0xff]   ;;  %v5754_v24 = vld [vmem:[#allocation2 + $0x49c] ss:$28 sps:$4 sm:$0xff]  }
  0xb0   :  { %v5749_v23 = vld [vmem:[#allocation2 + $0x468] ss:$28 sps:$4 sm:$0xff]   ;;  %v5752_v26 = vld [vmem:[#allocation2 + $0x498] ss:$28 sps:$4 sm:$0xff]   ;;  %v5755_v27 = vld [vmem:[#allocation2 + $0x4a0] ss:$28 sps:$4 sm:$0xff]  }
  0xb1   :  { %3018 = vmatpush1.bf16.msra.mxu0 %v5672_v30  ;;  %3182 = vmatpush1.bf16.msra.mxu1 %v5673_v31  ;;  %v5757_v25 = vld [vmem:[#allocation2 + $0x4a4] ss:$28 sps:$4 sm:$0xff]   ;;  %v5760_v28 = vld [vmem:[#allocation2 + $0x4d4] ss:$28 sps:$4 sm:$0xff]   ;;  %v5763_v29 = vld [vmem:[#allocation2 + $0x4dc] ss:$28 sps:$4 sm:$0xff]  }
  0xb2   :  { %3019 = vmatprep.subr.bf16.mxu0 %v5674_v32  ;;  %3183 = vmatprep.subr.bf16.mxu1 %v5676_v33  ;;  %v137_v30 = vld [vmem:[%s6925_s0 + $0x18] sm:$0xff]  ;;  %v5758_v31 = vld [vmem:[#allocation2 + $0x4d0] ss:$28 sps:$4 sm:$0xff]  }
  0xb3   :  { %v6835_v32 = vpack.c.bf16 %v137_v30, %v137_v30  ;;  %v5761_v33 = vld [vmem:[#allocation2 + $0x4d8] ss:$28 sps:$4 sm:$0xff]   ;;  %v5842_v30 = vld [vmem:[#allocation2 + $0x7e0] ss:$28 sps:$4 sm:$0xff]  }
  0xb4   :  { %v5784_v46 = vld [vmem:[#allocation2 + $0x5b4] ss:$28 sps:$4 sm:$0xff]  }
  0xb5   :  { %3020 = vmatpush1.bf16.msra.mxu0 %v5678_v34  ;;  %3184 = vmatpush1.bf16.msra.mxu1 %v5679_v35  ;;  %v5766_v34 = vld [vmem:[#allocation2 + $0x50c] ss:$28 sps:$4 sm:$0xff]   ;;  %v5769_v35 = vld [vmem:[#allocation2 + $0x514] ss:$28 sps:$4 sm:$0xff]  }
  0xb6   :  { %3021 = vmatprep.subr.bf16.mxu0 %v5680_v36  ;;  %3185 = vmatprep.subr.bf16.mxu1 %v5682_v37  ;;  %v5764_v36 = vld [vmem:[#allocation2 + $0x508] ss:$28 sps:$4 sm:$0xff]   ;;  %v5767_v37 = vld [vmem:[#allocation2 + $0x510] ss:$28 sps:$4 sm:$0xff]   ;;  %v5809_v2 = vld [vmem:[#allocation2 + $0x698] ss:$28 sps:$4 sm:$0xff]  }
  0xb9   :  { %3022 = vmatpush1.bf16.msra.mxu0 %v5684_v38  ;;  %3186 = vmatpush1.bf16.msra.mxu1 %v5685_v39  ;;  %v5772_v38 = vld [vmem:[#allocation2 + $0x544] ss:$28 sps:$4 sm:$0xff]   ;;  %v5775_v39 = vld [vmem:[#allocation2 + $0x54c] ss:$28 sps:$4 sm:$0xff]  }
  0xba   :  { %3023 = vmatprep.subr.bf16.mxu0 %v5686_v40  ;;  %3187 = vmatprep.subr.bf16.mxu1 %v5688_v41  ;;  %v5770_v40 = vld [vmem:[#allocation2 + $0x540] ss:$28 sps:$4 sm:$0xff]   ;;  %v5773_v41 = vld [vmem:[#allocation2 + $0x548] ss:$28 sps:$4 sm:$0xff]  }
  0xbd   :  { %3024 = vmatpush1.bf16.msra.mxu0 %v5690_v42  ;;  %3188 = vmatpush1.bf16.msra.mxu1 %v5691_v43  ;;  %v5778_v42 = vld [vmem:[#allocation2 + $0x57c] ss:$28 sps:$4 sm:$0xff]   ;;  %v5781_v43 = vld [vmem:[#allocation2 + $0x584] ss:$28 sps:$4 sm:$0xff]  }
  0xbe   :  { %3025 = vmatprep.subr.bf16.mxu0 %v5692_v44  ;;  %3189 = vmatprep.subr.bf16.mxu1 %v5694_v45  ;;  %v5776_v44 = vld [vmem:[#allocation2 + $0x578] ss:$28 sps:$4 sm:$0xff]   ;;  %v5779_v45 = vld [vmem:[#allocation2 + $0x580] ss:$28 sps:$4 sm:$0xff]  }
  0xc1   :  { %3026 = vmatpush1.bf16.msra.mxu0 %v5696_v47  ;;  %3190 = vmatpush1.bf16.msra.mxu1 %v5697_v49  ;;  %v5787_v47 = vld [vmem:[#allocation2 + $0x5bc] ss:$28 sps:$4 sm:$0xff]   ;;  %v5782_v49 = vld [vmem:[#allocation2 + $0x5b0] ss:$28 sps:$4 sm:$0xff]  }
  0xc2   :  { %3027 = vmatprep.subr.bf16.mxu0 %v5698_v50  ;;  %3191 = vmatprep.subr.bf16.mxu1 %v5700_v51  ;;  %v5785_v50 = vld [vmem:[#allocation2 + $0x5b8] ss:$28 sps:$4 sm:$0xff]   ;;  %v5790_v51 = vld [vmem:[#allocation2 + $0x5ec] ss:$28 sps:$4 sm:$0xff]  }
  0xc5   :  { %3028 = vmatpush1.bf16.msra.mxu0 %v5702_v52  ;;  %3192 = vmatpush1.bf16.msra.mxu1 %v5703_v53  ;;  %v5793_v52 = vld [vmem:[#allocation2 + $0x5f4] ss:$28 sps:$4 sm:$0xff]   ;;  %v5788_v53 = vld [vmem:[#allocation2 + $0x5e8] ss:$28 sps:$4 sm:$0xff]  }
  0xc6   :  { %3029 = vmatprep.subr.bf16.mxu0 %v5704_v54  ;;  %3193 = vmatprep.subr.bf16.mxu1 %v5706_v55  ;;  %v5791_v54 = vld [vmem:[#allocation2 + $0x5f0] ss:$28 sps:$4 sm:$0xff]   ;;  %v5796_v55 = vld [vmem:[#allocation2 + $0x624] ss:$28 sps:$4 sm:$0xff]  }
  0xc9   :  { %3030 = vmatpush1.bf16.msra.mxu0 %v5708_v56  ;;  %3194 = vmatpush1.bf16.msra.mxu1 %v5709_v57  ;;  %v5799_v56 = vld [vmem:[#allocation2 + $0x62c] ss:$28 sps:$4 sm:$0xff]   ;;  %v5794_v57 = vld [vmem:[#allocation2 + $0x620] ss:$28 sps:$4 sm:$0xff]  }
  0xca   :  { %3031 = vmatprep.subr.bf16.mxu0 %v5710_v58  ;;  %3195 = vmatprep.subr.bf16.mxu1 %v5712_v59  ;;  %v5797_v58 = vld [vmem:[#allocation2 + $0x628] ss:$28 sps:$4 sm:$0xff]   ;;  %v5802_v59 = vld [vmem:[#allocation2 + $0x65c] ss:$28 sps:$4 sm:$0xff]  }
  0xcd   :  { %3032 = vmatpush1.bf16.msra.mxu0 %v5714_v60  ;;  %3196 = vmatpush1.bf16.msra.mxu1 %v5715_v61  ;;  %v5805_v60 = vld [vmem:[#allocation2 + $0x664] ss:$28 sps:$4 sm:$0xff]   ;;  %v5800_v61 = vld [vmem:[#allocation2 + $0x658] ss:$28 sps:$4 sm:$0xff]  }
  0xce   :  { %3033 = vmatprep.subr.bf16.mxu0 %v5716_v62  ;;  %3197 = vmatprep.subr.bf16.mxu1 %v5718_v63  ;;  %v5803_v62 = vld [vmem:[#allocation2 + $0x660] ss:$28 sps:$4 sm:$0xff]   ;;  %v5808_v63 = vld [vmem:[#allocation2 + $0x694] ss:$28 sps:$4 sm:$0xff]  }
  0xd1   :  { %3034 = vmatpush1.bf16.msra.mxu0 %v5720_v0  ;;  %3198 = vmatpush1.bf16.msra.mxu1 %v5721_v1  ;;  %v5811_v0 = vld [vmem:[#allocation2 + $0x69c] ss:$28 sps:$4 sm:$0xff]   ;;  %v5806_v1 = vld [vmem:[#allocation2 + $0x690] ss:$28 sps:$4 sm:$0xff]  }
  0xd2   :  { %3044 = vmatprep.subr.bf16.mxu0 %v5724_v3  ;;  %3208 = vmatprep.subr.bf16.mxu1 %v5727_v4  ;;  %v5814_v3 = vld [vmem:[#allocation2 + $0x6cc] ss:$28 sps:$4 sm:$0xff]   ;;  %v5817_v4 = vld [vmem:[#allocation2 + $0x6d4] ss:$28 sps:$4 sm:$0xff]  }
  0xd4   :  { %3036 = vmatmul.mubr.bf16.vlgmr.msra.gmra.mrb[0].mxu0 %v6828_v5  ;;  %3200 = vmatmul.mubr.bf16.vlgmr.msra.gmra.mrb[0].mxu1 %v6828_v5 }
  0xd5   :  { %3045 = vmatpush1.bf16.msra.mxu0 %v5722_v6  ;;  %3209 = vmatpush1.bf16.msra.mxu1 %v5725_v7  ;;  %v5812_v6 = vld [vmem:[#allocation2 + $0x6c8] ss:$28 sps:$4 sm:$0xff]   ;;  %v5815_v7 = vld [vmem:[#allocation2 + $0x6d0] ss:$28 sps:$4 sm:$0xff]  }
  0xd6   :  { %3046 = vmatprep.subr.bf16.mxu0 %v5730_v8  ;;  %3210 = vmatprep.subr.bf16.mxu1 %v5733_v9  ;;  %v5820_v8 = vld [vmem:[#allocation2 + $0x704] ss:$28 sps:$4 sm:$0xff]   ;;  %v136_v9 = vld [vmem:[%s6925_s0 + $0x10] sm:$0xff] }
  0xd7   :  { %3076 = vmatprep.mubr.bf16.mxu0 %v6835_v32  ;;  %3240 = vmatprep.mubr.bf16.mxu1 %v6835_v32 }
  0xd9   :  { %3047 = vmatpush1.bf16.msra.mxu0 %v5728_v10  ;;  %3211 = vmatpush1.bf16.msra.mxu1 %v5731_v11  ;;  %v5823_v10 = vld [vmem:[#allocation2 + $0x70c] ss:$28 sps:$4 sm:$0xff]   ;;  %v5818_v11 = vld [vmem:[#allocation2 + $0x700] ss:$28 sps:$4 sm:$0xff]  }
  0xda   :  { %3048 = vmatprep.subr.bf16.mxu0 %v5736_v12  ;;  %3212 = vmatprep.subr.bf16.mxu1 %v5739_v13  ;;  %v5821_v12 = vld [vmem:[#allocation2 + $0x708] ss:$28 sps:$4 sm:$0xff]   ;;  %v6842_v13 = vpack.c.bf16 %v136_v9, %v136_v9  ;;  %v5902_v9 = vld [vmem:[#allocation2 + $0xa10] ss:$28 sps:$4 sm:$0xff]  }
  0xdd   :  { %3049 = vmatpush1.bf16.msra.mxu0 %v5734_v14  ;;  %3213 = vmatpush1.bf16.msra.mxu1 %v5737_v15  ;;  %v5826_v14 = vld [vmem:[#allocation2 + $0x73c] ss:$28 sps:$4 sm:$0xff]   ;;  %v5829_v15 = vld [vmem:[#allocation2 + $0x744] ss:$28 sps:$4 sm:$0xff]  }
  0xde   :  { %3050 = vmatprep.subr.bf16.mxu0 %v5742_v16  ;;  %3214 = vmatprep.subr.bf16.mxu1 %v5745_v17  ;;  %v139_v16 = vld [vmem:[%s6925_s0 + $0x28] sm:$0xff] }
  0xdf   :  { %v6847_v17 = vpack.c.bf16 %v139_v16, %v139_v16  ;;  %v5916_v16 = vld [vmem:[#allocation2 + $0xa84] ss:$28 sps:$4 sm:$0xff]  }
  0xe1   :  { %3051 = vmatpush1.bf16.msra.mxu0 %v5740_v18  ;;  %3215 = vmatpush1.bf16.msra.mxu1 %v5743_v19  ;;  %v5824_v18 = vld [vmem:[#allocation2 + $0x738] ss:$28 sps:$4 sm:$0xff]   ;;  %v5827_v19 = vld [vmem:[#allocation2 + $0x740] ss:$28 sps:$4 sm:$0xff]  }
  0xe2   :  { %3052 = vmatprep.subr.bf16.mxu0 %v5748_v20  ;;  %3216 = vmatprep.subr.bf16.mxu1 %v5751_v21  ;;  %v5832_v20 = vld [vmem:[#allocation2 + $0x774] ss:$28 sps:$4 sm:$0xff]   ;;  %v5835_v21 = vld [vmem:[#allocation2 + $0x77c] ss:$28 sps:$4 sm:$0xff]  }
  0xe5   :  { %3053 = vmatpush1.bf16.msra.mxu0 %v5746_v22  ;;  %3217 = vmatpush1.bf16.msra.mxu1 %v5749_v23  ;;  %v5830_v22 = vld [vmem:[#allocation2 + $0x770] ss:$28 sps:$4 sm:$0xff]   ;;  %v5833_v23 = vld [vmem:[#allocation2 + $0x778] ss:$28 sps:$4 sm:$0xff]  }
  0xe6   :  { %3054 = vmatprep.subr.bf16.mxu0 %v5754_v24  ;;  %3218 = vmatprep.subr.bf16.mxu1 %v5757_v25  ;;  %v5838_v24 = vld [vmem:[#allocation2 + $0x7ac] ss:$28 sps:$4 sm:$0xff]   ;;  %v5841_v25 = vld [vmem:[#allocation2 + $0x7b4] ss:$28 sps:$4 sm:$0xff]  }
  0xe9   :  { %3055 = vmatpush1.bf16.msra.mxu0 %v5752_v26  ;;  %3219 = vmatpush1.bf16.msra.mxu1 %v5755_v27  ;;  %v5836_v26 = vld [vmem:[#allocation2 + $0x7a8] ss:$28 sps:$4 sm:$0xff]   ;;  %v5839_v27 = vld [vmem:[#allocation2 + $0x7b0] ss:$28 sps:$4 sm:$0xff]  }
  0xea   :  { %3056 = vmatprep.subr.bf16.mxu0 %v5760_v28  ;;  %3220 = vmatprep.subr.bf16.mxu1 %v5763_v29  ;;  %v5844_v28 = vld [vmem:[#allocation2 + $0x7e4] ss:$28 sps:$4 sm:$0xff]   ;;  %v5847_v29 = vld [vmem:[#allocation2 + $0x7ec] ss:$28 sps:$4 sm:$0xff]  }
  0xed   :  { %3057 = vmatpush1.bf16.msra.mxu0 %v5758_v31  ;;  %3221 = vmatpush1.bf16.msra.mxu1 %v5761_v33  ;;  %v5845_v31 = vld [vmem:[#allocation2 + $0x7e8] ss:$28 sps:$4 sm:$0xff]   ;;  %v5850_v33 = vld [vmem:[#allocation2 + $0x81c] ss:$28 sps:$4 sm:$0xff]  }
  0xee   :  { %3058 = vmatprep.subr.bf16.mxu0 %v5766_v34  ;;  %3222 = vmatprep.subr.bf16.mxu1 %v5769_v35  ;;  %v5853_v34 = vld [vmem:[#allocation2 + $0x824] ss:$28 sps:$4 sm:$0xff]   ;;  %v5848_v35 = vld [vmem:[#allocation2 + $0x818] ss:$28 sps:$4 sm:$0xff]  }
  0xf1   :  { %3059 = vmatpush1.bf16.msra.mxu0 %v5764_v36  ;;  %3223 = vmatpush1.bf16.msra.mxu1 %v5767_v37  ;;  %v5851_v36 = vld [vmem:[#allocation2 + $0x820] ss:$28 sps:$4 sm:$0xff]   ;;  %v5856_v37 = vld [vmem:[#allocation2 + $0x854] ss:$28 sps:$4 sm:$0xff]  }
  0xf2   :  { %3060 = vmatprep.subr.bf16.mxu0 %v5772_v38  ;;  %3224 = vmatprep.subr.bf16.mxu1 %v5775_v39  ;;  %v5859_v38 = vld [vmem:[#allocation2 + $0x85c] ss:$28 sps:$4 sm:$0xff]   ;;  %v5854_v39 = vld [vmem:[#allocation2 + $0x850] ss:$28 sps:$4 sm:$0xff]  }
  0xf5   :  { %3061 = vmatpush1.bf16.msra.mxu0 %v5770_v40  ;;  %3225 = vmatpush1.bf16.msra.mxu1 %v5773_v41  ;;  %v5857_v40 = vld [vmem:[#allocation2 + $0x858] ss:$28 sps:$4 sm:$0xff]   ;;  %v5862_v41 = vld [vmem:[#allocation2 + $0x88c] ss:$28 sps:$4 sm:$0xff]  }
  0xf6   :  { %3062 = vmatprep.subr.bf16.mxu0 %v5778_v42  ;;  %3226 = vmatprep.subr.bf16.mxu1 %v5781_v43  ;;  %v5865_v42 = vld [vmem:[#allocation2 + $0x894] ss:$28 sps:$4 sm:$0xff]   ;;  %v5860_v43 = vld [vmem:[#allocation2 + $0x888] ss:$28 sps:$4 sm:$0xff]  }
  0xf9   :  { %3063 = vmatpush1.bf16.msra.mxu0 %v5776_v44  ;;  %3227 = vmatpush1.bf16.msra.mxu1 %v5779_v45  ;;  %v5863_v44 = vld [vmem:[#allocation2 + $0x890] ss:$28 sps:$4 sm:$0xff]   ;;  %v5868_v45 = vld [vmem:[#allocation2 + $0x8c4] ss:$28 sps:$4 sm:$0xff]  }
  0xfa   :  { %3064 = vmatprep.subr.bf16.mxu0 %v5784_v46  ;;  %3228 = vmatprep.subr.bf16.mxu1 %v5787_v47  ;;  %v5871_v46 = vld [vmem:[#allocation2 + $0x8cc] ss:$28 sps:$4 sm:$0xff]   ;;  %v5866_v47 = vld [vmem:[#allocation2 + $0x8c0] ss:$28 sps:$4 sm:$0xff]  }
  0xfd   :  { %3065 = vmatpush1.bf16.msra.mxu0 %v5782_v49  ;;  %3229 = vmatpush1.bf16.msra.mxu1 %v5785_v50  ;;  %v5869_v49 = vld [vmem:[#allocation2 + $0x8c8] ss:$28 sps:$4 sm:$0xff]   ;;  %v5874_v50 = vld [vmem:[#allocation2 + $0x8fc] ss:$28 sps:$4 sm:$0xff]  }
  0xfe   :  { %3066 = vmatprep.subr.bf16.mxu0 %v5790_v51  ;;  %3230 = vmatprep.subr.bf16.mxu1 %v5793_v52  ;;  %v5877_v51 = vld [vmem:[#allocation2 + $0x904] ss:$28 sps:$4 sm:$0xff]   ;;  %v5872_v52 = vld [vmem:[#allocation2 + $0x8f8] ss:$28 sps:$4 sm:$0xff]  }
 0x101   :  { %3067 = vmatpush1.bf16.msra.mxu0 %v5788_v53  ;;  %3231 = vmatpush1.bf16.msra.mxu1 %v5791_v54  ;;  %v5875_v53 = vld [vmem:[#allocation2 + $0x900] ss:$28 sps:$4 sm:$0xff]   ;;  %v5880_v54 = vld [vmem:[#allocation2 + $0x934] ss:$28 sps:$4 sm:$0xff]  }
 0x102   :  { %3068 = vmatprep.subr.bf16.mxu0 %v5796_v55  ;;  %3232 = vmatprep.subr.bf16.mxu1 %v5799_v56  ;;  %v5883_v55 = vld [vmem:[#allocation2 + $0x93c] ss:$28 sps:$4 sm:$0xff]   ;;  %v5878_v56 = vld [vmem:[#allocation2 + $0x930] ss:$28 sps:$4 sm:$0xff]  }
 0x105   :  { %3069 = vmatpush1.bf16.msra.mxu0 %v5794_v57  ;;  %3233 = vmatpush1.bf16.msra.mxu1 %v5797_v58  ;;  %v5881_v57 = vld [vmem:[#allocation2 + $0x938] ss:$28 sps:$4 sm:$0xff]   ;;  %v5886_v58 = vld [vmem:[#allocation2 + $0x96c] ss:$28 sps:$4 sm:$0xff]  }
 0x106   :  { %3070 = vmatprep.subr.bf16.mxu0 %v5802_v59  ;;  %3234 = vmatprep.subr.bf16.mxu1 %v5805_v60  ;;  %v5889_v59 = vld [vmem:[#allocation2 + $0x974] ss:$28 sps:$4 sm:$0xff]   ;;  %v5884_v60 = vld [vmem:[#allocation2 + $0x968] ss:$28 sps:$4 sm:$0xff]  }
 0x109   :  { %3071 = vmatpush1.bf16.msra.mxu0 %v5800_v61  ;;  %3235 = vmatpush1.bf16.msra.mxu1 %v5803_v62  ;;  %v5887_v61 = vld [vmem:[#allocation2 + $0x970] ss:$28 sps:$4 sm:$0xff]   ;;  %v5892_v62 = vld [vmem:[#allocation2 + $0x9a4] ss:$28 sps:$4 sm:$0xff]  }
 0x10a   :  { %3072 = vmatprep.subr.bf16.mxu0 %v5808_v63  ;;  %3236 = vmatprep.subr.bf16.mxu1 %v5811_v0  ;;  %v5895_v63 = vld [vmem:[#allocation2 + $0x9ac] ss:$28 sps:$4 sm:$0xff]   ;;  %v5890_v0 = vld [vmem:[#allocation2 + $0x9a0] ss:$28 sps:$4 sm:$0xff]  }
 0x10d   :  { %3073 = vmatpush1.bf16.msra.mxu0 %v5806_v1  ;;  %3237 = vmatpush1.bf16.msra.mxu1 %v5809_v2  ;;  %v5893_v1 = vld [vmem:[#allocation2 + $0x9a8] ss:$28 sps:$4 sm:$0xff]   ;;  %v5898_v2 = vld [vmem:[#allocation2 + $0x9dc] ss:$28 sps:$4 sm:$0xff]  }
 0x10e   :  { %3074 = vmatprep.subr.bf16.mxu0 %v5814_v3  ;;  %3238 = vmatprep.subr.bf16.mxu1 %v5817_v4  ;;  %v5901_v3 = vld [vmem:[#allocation2 + $0x9e4] ss:$28 sps:$4 sm:$0xff]   ;;  %v5896_v4 = vld [vmem:[#allocation2 + $0x9d8] ss:$28 sps:$4 sm:$0xff]  }
 0x111   :  { %3075 = vmatpush1.bf16.msra.mxu0 %v5812_v6  ;;  %3239 = vmatpush1.bf16.msra.mxu1 %v5815_v7  ;;  %v5899_v6 = vld [vmem:[#allocation2 + $0x9e0] ss:$28 sps:$4 sm:$0xff]   ;;  %v5904_v7 = vld [vmem:[#allocation2 + $0xa14] ss:$28 sps:$4 sm:$0xff]  }
 0x112   :  { %3085 = vmatprep.subr.bf16.mxu0 %v5820_v8  ;;  %3249 = vmatprep.subr.bf16.mxu1 %v5823_v10  ;;  %v5907_v8 = vld [vmem:[#allocation2 + $0xa1c] ss:$28 sps:$4 sm:$0xff]  }
 0x113   :  { %v5905_v10 = vld [vmem:[#allocation2 + $0xa18] ss:$28 sps:$4 sm:$0xff]  }
 0x114   :  { %3077 = vmatmul.mubr.bf16.vlgmr.msra.gmra.mrb[0].mxu0 %v6842_v13  ;;  %3241 = vmatmul.mubr.bf16.vlgmr.msra.gmra.mrb[0].mxu1 %v6842_v13 }
 0x115   :  { %3086 = vmatpush1.bf16.msra.mxu0 %v5818_v11  ;;  %3250 = vmatpush1.bf16.msra.mxu1 %v5821_v12  ;;  %v5910_v11 = vld [vmem:[#allocation2 + $0xa4c] ss:$28 sps:$4 sm:$0xff]   ;;  %v5913_v12 = vld [vmem:[#allocation2 + $0xa54] ss:$28 sps:$4 sm:$0xff]  }
 0x116   :  { %3087 = vmatprep.subr.bf16.mxu0 %v5826_v14  ;;  %3251 = vmatprep.subr.bf16.mxu1 %v5829_v15  ;;  %v5908_v14 = vld [vmem:[#allocation2 + $0xa48] ss:$28 sps:$4 sm:$0xff]   ;;  %v5911_v15 = vld [vmem:[#allocation2 + $0xa50] ss:$28 sps:$4 sm:$0xff]  }
 0x117   :  { %3117 = vmatprep.mubr.bf16.mxu0 %v6847_v17  ;;  %3281 = vmatprep.mubr.bf16.mxu1 %v6847_v17 }
 0x119   :  { %3088 = vmatpush1.bf16.msra.mxu0 %v5824_v18  ;;  %3252 = vmatpush1.bf16.msra.mxu1 %v5827_v19  ;;  %v138_v18 = vld [vmem:[%s6925_s0 + $0x20] sm:$0xff]  ;;  %v5919_v19 = vld [vmem:[#allocation2 + $0xa8c] ss:$28 sps:$4 sm:$0xff]  }
 0x11a   :  { %3089 = vmatprep.subr.bf16.mxu0 %v5832_v20  ;;  %3253 = vmatprep.subr.bf16.mxu1 %v5835_v21  ;;  %v5914_v20 = vld [vmem:[#allocation2 + $0xa80] ss:$28 sps:$4 sm:$0xff]   ;;  %v5917_v21 = vld [vmem:[#allocation2 + $0xa88] ss:$28 sps:$4 sm:$0xff]  }
 0x11d   :  { %3090 = vmatpush1.bf16.msra.mxu0 %v5830_v22  ;;  %3254 = vmatpush1.bf16.msra.mxu1 %v5833_v23  ;;  %v6856_v22 = vpack.c.bf16 %v138_v18, %v138_v18  ;;  %v141_v23 = vld [vmem:[%s6925_s0 + $0x38] sm:$0xff]  ;;  %v6000_v18 = vld [vmem:[#allocation2 + $0xd94] ss:$28 sps:$4 sm:$0xff]  }
 0x11e   :  { %3091 = vmatprep.subr.bf16.mxu0 %v5838_v24  ;;  %3255 = vmatprep.subr.bf16.mxu1 %v5841_v25  ;;  %v5922_v24 = vld [vmem:[#allocation2 + $0xabc] ss:$28 sps:$4 sm:$0xff]   ;;  %v5925_v25 = vld [vmem:[#allocation2 + $0xac4] ss:$28 sps:$4 sm:$0xff]  }
 0x121   :  { %3092 = vmatpush1.bf16.msra.mxu0 %v5836_v26  ;;  %3256 = vmatpush1.bf16.msra.mxu1 %v5839_v27  ;;  %v5920_v26 = vld [vmem:[#allocation2 + $0xab8] ss:$28 sps:$4 sm:$0xff]   ;;  %v6861_v27 = vpack.c.bf16 %v141_v23, %v141_v23  ;;  %v6006_v23 = vld [vmem:[#allocation2 + $0xdcc] ss:$28 sps:$4 sm:$0xff]  }
 0x122   :  { %3093 = vmatprep.subr.bf16.mxu0 %v5844_v28  ;;  %3257 = vmatprep.subr.bf16.mxu1 %v5847_v29  ;;  %v5923_v28 = vld [vmem:[#allocation2 + $0xac0] ss:$28 sps:$4 sm:$0xff]   ;;  %v5928_v29 = vld [vmem:[#allocation2 + $0xaf4] ss:$28 sps:$4 sm:$0xff]  }
 0x125   :  { %3094 = vmatpush1.bf16.msra.mxu0 %v5842_v30  ;;  %3258 = vmatpush1.bf16.msra.mxu1 %v5845_v31  ;;  %v5931_v30 = vld [vmem:[#allocation2 + $0xafc] ss:$28 sps:$4 sm:$0xff]   ;;  %v5926_v31 = vld [vmem:[#allocation2 + $0xaf0] ss:$28 sps:$4 sm:$0xff]  }
 0x126   :  { %3095 = vmatprep.subr.bf16.mxu0 %v5850_v33  ;;  %3259 = vmatprep.subr.bf16.mxu1 %v5853_v34  ;;  %v5929_v33 = vld [vmem:[#allocation2 + $0xaf8] ss:$28 sps:$4 sm:$0xff]   ;;  %v5934_v34 = vld [vmem:[#allocation2 + $0xb2c] ss:$28 sps:$4 sm:$0xff]  }
 0x129   :  { %3096 = vmatpush1.bf16.msra.mxu0 %v5848_v35  ;;  %3260 = vmatpush1.bf16.msra.mxu1 %v5851_v36  ;;  %v5937_v35 = vld [vmem:[#allocation2 + $0xb34] ss:$28 sps:$4 sm:$0xff]   ;;  %v5932_v36 = vld [vmem:[#allocation2 + $0xb28] ss:$28 sps:$4 sm:$0xff]  }
 0x12a   :  { %3097 = vmatprep.subr.bf16.mxu0 %v5856_v37  ;;  %3261 = vmatprep.subr.bf16.mxu1 %v5859_v38  ;;  %v5935_v37 = vld [vmem:[#allocation2 + $0xb30] ss:$28 sps:$4 sm:$0xff]   ;;  %v5940_v38 = vld [vmem:[#allocation2 + $0xb64] ss:$28 sps:$4 sm:$0xff]  }
 0x12d   :  { %3098 = vmatpush1.bf16.msra.mxu0 %v5854_v39  ;;  %3262 = vmatpush1.bf16.msra.mxu1 %v5857_v40  ;;  %v5943_v39 = vld [vmem:[#allocation2 + $0xb6c] ss:$28 sps:$4 sm:$0xff]   ;;  %v5938_v40 = vld [vmem:[#allocation2 + $0xb60] ss:$28 sps:$4 sm:$0xff]  }
 0x12e   :  { %3099 = vmatprep.subr.bf16.mxu0 %v5862_v41  ;;  %3263 = vmatprep.subr.bf16.mxu1 %v5865_v42  ;;  %v5941_v41 = vld [vmem:[#allocation2 + $0xb68] ss:$28 sps:$4 sm:$0xff]   ;;  %v5946_v42 = vld [vmem:[#allocation2 + $0xb9c] ss:$28 sps:$4 sm:$0xff]  }
 0x131   :  { %3100 = vmatpush1.bf16.msra.mxu0 %v5860_v43  ;;  %3264 = vmatpush1.bf16.msra.mxu1 %v5863_v44  ;;  %v5949_v43 = vld [vmem:[#allocation2 + $0xba4] ss:$28 sps:$4 sm:$0xff]   ;;  %v5944_v44 = vld [vmem:[#allocation2 + $0xb98] ss:$28 sps:$4 sm:$0xff]  }
 0x132   :  { %3101 = vmatprep.subr.bf16.mxu0 %v5868_v45  ;;  %3265 = vmatprep.subr.bf16.mxu1 %v5871_v46  ;;  %v5947_v45 = vld [vmem:[#allocation2 + $0xba0] ss:$28 sps:$4 sm:$0xff]   ;;  %v5952_v46 = vld [vmem:[#allocation2 + $0xbd4] ss:$28 sps:$4 sm:$0xff]  }
 0x135   :  { %3102 = vmatpush1.bf16.msra.mxu0 %v5866_v47  ;;  %3266 = vmatpush1.bf16.msra.mxu1 %v5869_v49  ;;  %v5955_v47 = vld [vmem:[#allocation2 + $0xbdc] ss:$28 sps:$4 sm:$0xff]   ;;  %v5950_v49 = vld [vmem:[#allocation2 + $0xbd0] ss:$28 sps:$4 sm:$0xff]  }
 0x136   :  { %3103 = vmatprep.subr.bf16.mxu0 %v5874_v50  ;;  %3267 = vmatprep.subr.bf16.mxu1 %v5877_v51  ;;  %v5953_v50 = vld [vmem:[#allocation2 + $0xbd8] ss:$28 sps:$4 sm:$0xff]   ;;  %v5958_v51 = vld [vmem:[#allocation2 + $0xc0c] ss:$28 sps:$4 sm:$0xff]  }
 0x139   :  { %3104 = vmatpush1.bf16.msra.mxu0 %v5872_v52  ;;  %3268 = vmatpush1.bf16.msra.mxu1 %v5875_v53  ;;  %v5961_v52 = vld [vmem:[#allocation2 + $0xc14] ss:$28 sps:$4 sm:$0xff]   ;;  %v5956_v53 = vld [vmem:[#allocation2 + $0xc08] ss:$28 sps:$4 sm:$0xff]  }
 0x13a   :  { %3105 = vmatprep.subr.bf16.mxu0 %v5880_v54  ;;  %3269 = vmatprep.subr.bf16.mxu1 %v5883_v55  ;;  %v5959_v54 = vld [vmem:[#allocation2 + $0xc10] ss:$28 sps:$4 sm:$0xff]   ;;  %v5964_v55 = vld [vmem:[#allocation2 + $0xc44] ss:$28 sps:$4 sm:$0xff]  }
 0x13d   :  { %3106 = vmatpush1.bf16.msra.mxu0 %v5878_v56  ;;  %3270 = vmatpush1.bf16.msra.mxu1 %v5881_v57  ;;  %v5967_v56 = vld [vmem:[#allocation2 + $0xc4c] ss:$28 sps:$4 sm:$0xff]   ;;  %v5962_v57 = vld [vmem:[#allocation2 + $0xc40] ss:$28 sps:$4 sm:$0xff]  }
 0x13e   :  { %3107 = vmatprep.subr.bf16.mxu0 %v5886_v58  ;;  %3271 = vmatprep.subr.bf16.mxu1 %v5889_v59  ;;  %v5965_v58 = vld [vmem:[#allocation2 + $0xc48] ss:$28 sps:$4 sm:$0xff]   ;;  %v5970_v59 = vld [vmem:[#allocation2 + $0xc7c] ss:$28 sps:$4 sm:$0xff]  }
 0x141   :  { %3108 = vmatpush1.bf16.msra.mxu0 %v5884_v60  ;;  %3272 = vmatpush1.bf16.msra.mxu1 %v5887_v61  ;;  %v5973_v60 = vld [vmem:[#allocation2 + $0xc84] ss:$28 sps:$4 sm:$0xff]   ;;  %v5968_v61 = vld [vmem:[#allocation2 + $0xc78] ss:$28 sps:$4 sm:$0xff]  }
 0x142   :  { %3109 = vmatprep.subr.bf16.mxu0 %v5892_v62  ;;  %3273 = vmatprep.subr.bf16.mxu1 %v5895_v63  ;;  %v5971_v62 = vld [vmem:[#allocation2 + $0xc80] ss:$28 sps:$4 sm:$0xff]   ;;  %v5976_v63 = vld [vmem:[#allocation2 + $0xcb4] ss:$28 sps:$4 sm:$0xff]  }
 0x145   :  { %3110 = vmatpush1.bf16.msra.mxu0 %v5890_v0  ;;  %3274 = vmatpush1.bf16.msra.mxu1 %v5893_v1  ;;  %v5979_v0 = vld [vmem:[#allocation2 + $0xcbc] ss:$28 sps:$4 sm:$0xff]   ;;  %v5974_v1 = vld [vmem:[#allocation2 + $0xcb0] ss:$28 sps:$4 sm:$0xff]  }
 0x146   :  { %3111 = vmatprep.subr.bf16.mxu0 %v5898_v2  ;;  %3275 = vmatprep.subr.bf16.mxu1 %v5901_v3  ;;  %v5977_v2 = vld [vmem:[#allocation2 + $0xcb8] ss:$28 sps:$4 sm:$0xff]   ;;  %v5982_v3 = vld [vmem:[#allocation2 + $0xcec] ss:$28 sps:$4 sm:$0xff]  }
 0x149   :  { %3112 = vmatpush1.bf16.msra.mxu0 %v5896_v4  ;;  %3276 = vmatpush1.bf16.msra.mxu1 %v5899_v6  ;;  %v5985_v4 = vld [vmem:[#allocation2 + $0xcf4] ss:$28 sps:$4 sm:$0xff]   ;;  %v5980_v6 = vld [vmem:[#allocation2 + $0xce8] ss:$28 sps:$4 sm:$0xff]  }
 0x14a   :  { %3113 = vmatprep.subr.bf16.mxu0 %v5904_v7  ;;  %3277 = vmatprep.subr.bf16.mxu1 %v5907_v8  ;;  %v5983_v7 = vld [vmem:[#allocation2 + $0xcf0] ss:$28 sps:$4 sm:$0xff]   ;;  %v5988_v8 = vld [vmem:[#allocation2 + $0xd24] ss:$28 sps:$4 sm:$0xff]  }
 0x14d   :  { %3114 = vmatpush1.bf16.msra.mxu0 %v5902_v9  ;;  %3278 = vmatpush1.bf16.msra.mxu1 %v5905_v10  ;;  %v5991_v9 = vld [vmem:[#allocation2 + $0xd2c] ss:$28 sps:$4 sm:$0xff]   ;;  %v5986_v10 = vld [vmem:[#allocation2 + $0xd20] ss:$28 sps:$4 sm:$0xff]  }
 0x14e   :  { %3115 = vmatprep.subr.bf16.mxu0 %v5910_v11  ;;  %3279 = vmatprep.subr.bf16.mxu1 %v5913_v12  ;;  %v5989_v11 = vld [vmem:[#allocation2 + $0xd28] ss:$28 sps:$4 sm:$0xff]   ;;  %v5994_v12 = vld [vmem:[#allocation2 + $0xd5c] ss:$28 sps:$4 sm:$0xff]  }
 0x151   :  { %3116 = vmatpush1.bf16.msra.mxu0 %v5908_v14  ;;  %3280 = vmatpush1.bf16.msra.mxu1 %v5911_v15  ;;  %v5997_v14 = vld [vmem:[#allocation2 + $0xd64] ss:$28 sps:$4 sm:$0xff]   ;;  %v5992_v15 = vld [vmem:[#allocation2 + $0xd58] ss:$28 sps:$4 sm:$0xff]  }
 0x152   :  { %3126 = vmatprep.subr.bf16.mxu0 %v5916_v16  ;;  %3290 = vmatprep.subr.bf16.mxu1 %v5919_v19  ;;  %v5995_v16 = vld [vmem:[#allocation2 + $0xd60] ss:$28 sps:$4 sm:$0xff]  }
 0x153   :  { %v6003_v19 = vld [vmem:[#allocation2 + $0xd9c] ss:$28 sps:$4 sm:$0xff]  }
 0x154   :  { %3118 = vmatmul.mubr.bf16.vlgmr.msra.gmra.mrb[0].mxu0 %v6856_v22  ;;  %3282 = vmatmul.mubr.bf16.vlgmr.msra.gmra.mrb[0].mxu1 %v6856_v22 }
 0x155   :  { %3127 = vmatpush1.bf16.msra.mxu0 %v5914_v20  ;;  %3291 = vmatpush1.bf16.msra.mxu1 %v5917_v21  ;;  %v5998_v20 = vld [vmem:[#allocation2 + $0xd90] ss:$28 sps:$4 sm:$0xff]   ;;  %v6001_v21 = vld [vmem:[#allocation2 + $0xd98] ss:$28 sps:$4 sm:$0xff]  }
 0x156   :  { %3128 = vmatprep.subr.bf16.mxu0 %v5922_v24  ;;  %3292 = vmatprep.subr.bf16.mxu1 %v5925_v25  ;;  %v6009_v24 = vld [vmem:[#allocation2 + $0xdd4] ss:$28 sps:$4 sm:$0xff]   ;;  %v6004_v25 = vld [vmem:[#allocation2 + $0xdc8] ss:$28 sps:$4 sm:$0xff]  }
 0x157   :  { %3158 = vmatprep.mubr.bf16.mxu0 %v6861_v27  ;;  %3322 = vmatprep.mubr.bf16.mxu1 %v6861_v27 }
 0x159   :  { %3129 = vmatpush1.bf16.msra.mxu0 %v5920_v26  ;;  %3293 = vmatpush1.bf16.msra.mxu1 %v5923_v28  ;;  %v6007_v26 = vld [vmem:[#allocation2 + $0xdd0] ss:$28 sps:$4 sm:$0xff]  }
 0x15a   :  { %3130 = vmatprep.subr.bf16.mxu0 %v5928_v29  ;;  %3294 = vmatprep.subr.bf16.mxu1 %v5931_v30  ;;  %v140_v28 = vld [vmem:[%s6925_s0 + $0x30] sm:$0xff] }
 0x15b   :  { %v6012_v29 = vld [vmem:[#allocation2 + $0x14] ss:$28 sps:$4 sm:$0xff]  }
 0x15c   :  { %v6031_v30 = vld [vmem:[#allocation2 + $0x1d8] ss:$28 sps:$4 sm:$0xff]  }
 0x15d   :  { %3131 = vmatpush1.bf16.msra.mxu0 %v5926_v31  ;;  %3295 = vmatpush1.bf16.msra.mxu1 %v5929_v33  ;;  %v6010_v31 = vld [vmem:[#allocation2 + $0x10] ss:$28 sps:$4 sm:$0xff]   ;;  %v6870_v33 = vpack.c.bf16 %v140_v28, %v140_v28 }
 0x15e   :  { %3132 = vmatprep.subr.bf16.mxu0 %v5934_v34  ;;  %3296 = vmatprep.subr.bf16.mxu1 %v5937_v35  ;;  %v6015_v34 = vld [vmem:[#allocation2 + $0x4c] ss:$28 sps:$4 sm:$0xff]   ;;  %v6035_v35 = vld [vmem:[#allocation2 + $0x18] ss:$28 sps:$4 sm:$0xff]  }
 0x15f   :  { %v6100_v28 = vld [vmem:[#allocation2 + $0x4b0] ss:$28 sps:$4 sm:$0xff]  }
 0x161   :  { %3133 = vmatpush1.bf16.msra.mxu0 %v5932_v36  ;;  %3297 = vmatpush1.bf16.msra.mxu1 %v5935_v37  ;;  %v6036_v36 = vld [vmem:[#allocation2 + $0x210] ss:$28 sps:$4 sm:$0xff]   ;;  %v6013_v37 = vld [vmem:[#allocation2 + $0x48] ss:$28 sps:$4 sm:$0xff]  }
 0x162   :  { %3134 = vmatprep.subr.bf16.mxu0 %v5940_v38  ;;  %3298 = vmatprep.subr.bf16.mxu1 %v5943_v39  ;;  %v6040_v38 = vld [vmem:[#allocation2 + $0x50] ss:$28 sps:$4 sm:$0xff]   ;;  %v6018_v39 = vld [vmem:[#allocation2 + $0x84] ss:$28 sps:$4 sm:$0xff]  }
 0x165   :  { %3135 = vmatpush1.bf16.msra.mxu0 %v5938_v40  ;;  %3299 = vmatpush1.bf16.msra.mxu1 %v5941_v41  ;;  %v6041_v40 = vld [vmem:[#allocation2 + $0x248] ss:$28 sps:$4 sm:$0xff]   ;;  %v6016_v41 = vld [vmem:[#allocation2 + $0x80] ss:$28 sps:$4 sm:$0xff]  }
 0x166   :  { %3136 = vmatprep.subr.bf16.mxu0 %v5946_v42  ;;  %3300 = vmatprep.subr.bf16.mxu1 %v5949_v43  ;;  %v6021_v42 = vld [vmem:[#allocation2 + $0xbc] ss:$28 sps:$4 sm:$0xff]   ;;  %v6045_v43 = vld [vmem:[#allocation2 + $0x88] ss:$28 sps:$4 sm:$0xff]  }
 0x169   :  { %3137 = vmatpush1.bf16.msra.mxu0 %v5944_v44  ;;  %3301 = vmatpush1.bf16.msra.mxu1 %v5947_v45  ;;  %v6046_v44 = vld [vmem:[#allocation2 + $0x280] ss:$28 sps:$4 sm:$0xff]   ;;  %v6019_v45 = vld [vmem:[#allocation2 + $0xb8] ss:$28 sps:$4 sm:$0xff]  }
 0x16a   :  { %3138 = vmatprep.subr.bf16.mxu0 %v5952_v46  ;;  %3302 = vmatprep.subr.bf16.mxu1 %v5955_v47  ;;  %v6024_v46 = vld [vmem:[#allocation2 + $0xf4] ss:$28 sps:$4 sm:$0xff]   ;;  %v6050_v47 = vld [vmem:[#allocation2 + $0xc0] ss:$28 sps:$4 sm:$0xff]  }
 0x16d   :  { %3139 = vmatpush1.bf16.msra.mxu0 %v5950_v49  ;;  %3303 = vmatpush1.bf16.msra.mxu1 %v5953_v50  ;;  %v6051_v49 = vld [vmem:[#allocation2 + $0x2b8] ss:$28 sps:$4 sm:$0xff]   ;;  %v6022_v50 = vld [vmem:[#allocation2 + $0xf0] ss:$28 sps:$4 sm:$0xff]  }
 0x16e   :  { %3140 = vmatprep.subr.bf16.mxu0 %v5958_v51  ;;  %3304 = vmatprep.subr.bf16.mxu1 %v5961_v52  ;;  %v6027_v51 = vld [vmem:[#allocation2 + $0x12c] ss:$28 sps:$4 sm:$0xff]  }
 0x16f   :  { %v6056_v52 = vld [vmem:[#allocation2 + $0x2f0] ss:$28 sps:$4 sm:$0xff]  }
 0x171   :  { %3141 = vmatpush1.bf16.msra.mxu0 %v5956_v53  ;;  %3305 = vmatpush1.bf16.msra.mxu1 %v5959_v54  ;;  %v6025_v53 = vld [vmem:[#allocation2 + $0x128] ss:$28 sps:$4 sm:$0xff]  }
 0x172   :  { %3142 = vmatprep.subr.bf16.mxu0 %v5964_v55  ;;  %3306 = vmatprep.subr.bf16.mxu1 %v5967_v56  ;;  %v6030_v54 = vld [vmem:[#allocation2 + $0x164] ss:$28 sps:$4 sm:$0xff]   ;;  %v6060_v55 = vld [vmem:[#allocation2 + $0x130] ss:$28 sps:$4 sm:$0xff]  }
 0x173   :  { %v6061_v56 = vld [vmem:[#allocation2 + $0x328] ss:$28 sps:$4 sm:$0xff]  }
 0x175   :  { %3143 = vmatpush1.bf16.msra.mxu0 %v5962_v57  ;;  %3307 = vmatpush1.bf16.msra.mxu1 %v5965_v58  ;;  %v6028_v57 = vld [vmem:[#allocation2 + $0x160] ss:$28 sps:$4 sm:$0xff]   ;;  %v6065_v58 = vld [vmem:[#allocation2 + $0x168] ss:$28 sps:$4 sm:$0xff]  }
 0x176   :  { %3144 = vmatprep.subr.bf16.mxu0 %v5970_v59  ;;  %3308 = vmatprep.subr.bf16.mxu1 %v5973_v60  ;;  %v6034_v59 = vld [vmem:[#allocation2 + $0x19c] ss:$28 sps:$4 sm:$0xff]  }
 0x177   :  { %v6066_v60 = vld [vmem:[#allocation2 + $0x360] ss:$28 sps:$4 sm:$0xff]  }
 0x179   :  { %3145 = vmatpush1.bf16.msra.mxu0 %v5968_v61  ;;  %3309 = vmatpush1.bf16.msra.mxu1 %v5971_v62  ;;  %v6032_v61 = vld [vmem:[#allocation2 + $0x198] ss:$28 sps:$4 sm:$0xff]  }
 0x17a   :  { %3146 = vmatprep.subr.bf16.mxu0 %v5976_v63  ;;  %3310 = vmatprep.subr.bf16.mxu1 %v5979_v0  ;;  %v6039_v62 = vld [vmem:[#allocation2 + $0x1d4] ss:$28 sps:$4 sm:$0xff]   ;;  %v6070_v63 = vld [vmem:[#allocation2 + $0x1a0] ss:$28 sps:$4 sm:$0xff]  }
 0x17b   :  { %v6071_v0 = vld [vmem:[#allocation2 + $0x558] ss:$28 sps:$4 sm:$0xff]  }
 0x17d   :  { %3147 = vmatpush1.bf16.msra.mxu0 %v5974_v1  ;;  %3311 = vmatpush1.bf16.msra.mxu1 %v5977_v2  ;;  %v6037_v1 = vld [vmem:[#allocation2 + $0x1d0] ss:$28 sps:$4 sm:$0xff]  }
 0x17e   :  { %3148 = vmatprep.subr.bf16.mxu0 %v5982_v3  ;;  %3312 = vmatprep.subr.bf16.mxu1 %v5985_v4  ;;  %v6044_v2 = vld [vmem:[#allocation2 + $0x20c] ss:$28 sps:$4 sm:$0xff]   ;;  %v6075_v3 = vld [vmem:[#allocation2 + $0x398] ss:$28 sps:$4 sm:$0xff]  }
 0x17f   :  { %v6076_v4 = vld [vmem:[#allocation2 + $0x590] ss:$28 sps:$4 sm:$0xff]  }
 0x181   :  { %3149 = vmatpush1.bf16.msra.mxu0 %v5980_v6  ;;  %3313 = vmatpush1.bf16.msra.mxu1 %v5983_v7  ;;  %v6042_v6 = vld [vmem:[#allocation2 + $0x208] ss:$28 sps:$4 sm:$0xff]  }
 0x182   :  { %3150 = vmatprep.subr.bf16.mxu0 %v5988_v8  ;;  %3314 = vmatprep.subr.bf16.mxu1 %v5991_v9  ;;  %v6049_v7 = vld [vmem:[#allocation2 + $0x244] ss:$28 sps:$4 sm:$0xff]   ;;  %v6080_v8 = vld [vmem:[#allocation2 + $0x3d0] ss:$28 sps:$4 sm:$0xff]  }
 0x183   :  { %v6081_v9 = vld [vmem:[#allocation2 + $0x5c8] ss:$28 sps:$4 sm:$0xff]  }
 0x185   :  { %3151 = vmatpush1.bf16.msra.mxu0 %v5986_v10  ;;  %3315 = vmatpush1.bf16.msra.mxu1 %v5989_v11  ;;  %v6047_v10 = vld [vmem:[#allocation2 + $0x240] ss:$28 sps:$4 sm:$0xff]  }
 0x186   :  { %3152 = vmatprep.subr.bf16.mxu0 %v5994_v12  ;;  %3316 = vmatprep.subr.bf16.mxu1 %v5997_v14  ;;  %v6054_v11 = vld [vmem:[#allocation2 + $0x27c] ss:$28 sps:$4 sm:$0xff]   ;;  %v6085_v12 = vld [vmem:[#allocation2 + $0x408] ss:$28 sps:$4 sm:$0xff]  }
 0x187   :  { %v6086_v14 = vld [vmem:[#allocation2 + $0x600] ss:$28 sps:$4 sm:$0xff]  }
 0x189   :  { %3153 = vmatpush1.bf16.msra.mxu0 %v5992_v15  ;;  %3317 = vmatpush1.bf16.msra.mxu1 %v5995_v16  ;;  %v6052_v15 = vld [vmem:[#allocation2 + $0x278] ss:$28 sps:$4 sm:$0xff]  }
 0x18a   :  { %3154 = vmatprep.subr.bf16.mxu0 %v6000_v18  ;;  %3318 = vmatprep.subr.bf16.mxu1 %v6003_v19  ;;  %v6059_v16 = vld [vmem:[#allocation2 + $0x2b4] ss:$28 sps:$4 sm:$0xff]   ;;  %v6090_v18 = vld [vmem:[#allocation2 + $0x440] ss:$28 sps:$4 sm:$0xff]  }
 0x18b   :  { %v6091_v19 = vld [vmem:[#allocation2 + $0x638] ss:$28 sps:$4 sm:$0xff]  }
 0x18d   :  { %3155 = vmatpush1.bf16.msra.mxu0 %v5998_v20  ;;  %3319 = vmatpush1.bf16.msra.mxu1 %v6001_v21  ;;  %v6057_v20 = vld [vmem:[#allocation2 + $0x2b0] ss:$28 sps:$4 sm:$0xff]  }
 0x18e   :  { %3156 = vmatprep.subr.bf16.mxu0 %v6006_v23  ;;  %3320 = vmatprep.subr.bf16.mxu1 %v6009_v24  ;;  %v6064_v21 = vld [vmem:[#allocation2 + $0x2ec] ss:$28 sps:$4 sm:$0xff]   ;;  %v6095_v23 = vld [vmem:[#allocation2 + $0x478] ss:$28 sps:$4 sm:$0xff]  }
 0x18f   :  { %v6096_v24 = vld [vmem:[#allocation2 + $0x670] ss:$28 sps:$4 sm:$0xff]  }
 0x191   :  { %3157 = vmatpush1.bf16.msra.mxu0 %v6004_v25  ;;  %3321 = vmatpush1.bf16.msra.mxu1 %v6007_v26  ;;  %v6062_v25 = vld [vmem:[#allocation2 + $0x2e8] ss:$28 sps:$4 sm:$0xff]  }
 0x192   :  { %3331 = vmatprep.subr.bf16.mxu0 %v6012_v29  ;;  %5414 = vmatprep.subr.bf16.mxu1 %v6031_v30  ;;  %v6069_v26 = vld [vmem:[#allocation2 + $0x324] ss:$28 sps:$4 sm:$0xff]  }
 0x193   :  { %v6101_v29 = vld [vmem:[#allocation2 + $0x6a8] ss:$28 sps:$4 sm:$0xff]   ;;  %v6067_v30 = vld [vmem:[#allocation2 + $0x320] ss:$28 sps:$4 sm:$0xff]  }
 0x194   :  { %3159 = vmatmul.mubr.bf16.vlgmr.msra.gmra.mrb[0].mxu0 %v6870_v33  ;;  %3323 = vmatmul.mubr.bf16.vlgmr.msra.gmra.mrb[0].mxu1 %v6870_v33 }
 0x195   :  { %3332 = vmatpush1.bf16.msra.mxu0 %v6010_v31  ;;  %5415 = vmatpush3.bf16.msra.mxu1 %v6035_v35  ;;  %v6074_v31 = vld [vmem:[#allocation2 + $0x35c] ss:$28 sps:$4 sm:$0xff]  }
 0x196   :  { %3333 = vmatprep.subr.bf16.mxu0 %v6015_v34  ;;  %5416 = vmatprep.subr.bf16.mxu1 %v6036_v36  ;;  %v6105_v34 = vld [vmem:[#allocation2 + $0x4e8] ss:$28 sps:$4 sm:$0xff]   ;;  %v6106_v35 = vld [vmem:[#allocation2 + $0x6e0] ss:$28 sps:$4 sm:$0xff]   ;;  %v6072_v36 = vld [vmem:[#allocation2 + $0x358] ss:$28 sps:$4 sm:$0xff]  }
 0x197   :  { %3527 = vmatprep.mubr.bf16.mxu1 %v6821_v48  ;;  %3363 = vmatprep.mubr.bf16.mxu0 %v6821_v48  ;;  %v6055_v48 = vld [vmem:[#allocation2 + $0xf8] ss:$28 sps:$4 sm:$0xff]  }
 0x199   :  { %3334 = vmatpush1.bf16.msra.mxu0 %v6013_v37  ;;  %5417 = vmatpush3.bf16.msra.mxu1 %v6040_v38  ;;  %v6079_v37 = vld [vmem:[#allocation2 + $0x394] ss:$28 sps:$4 sm:$0xff]   ;;  %v6110_v38 = vld [vmem:[#allocation2 + $0x520] ss:$28 sps:$4 sm:$0xff]  }
 0x19a   :  { %3335 = vmatprep.subr.bf16.mxu0 %v6018_v39  ;;  %5418 = vmatprep.subr.bf16.mxu1 %v6041_v40  ;;  %v6111_v39 = vld [vmem:[#allocation2 + $0x8d8] ss:$28 sps:$4 sm:$0xff]   ;;  %v6077_v40 = vld [vmem:[#allocation2 + $0x390] ss:$28 sps:$4 sm:$0xff]  }
 0x19d   :  { %3336 = vmatpush1.bf16.msra.mxu0 %v6016_v41  ;;  %5419 = vmatpush3.bf16.msra.mxu1 %v6045_v43  ;;  %v6084_v41 = vld [vmem:[#allocation2 + $0x3cc] ss:$28 sps:$4 sm:$0xff]  }
 0x19e   :  { %3337 = vmatprep.subr.bf16.mxu0 %v6021_v42  ;;  %5420 = vmatprep.subr.bf16.mxu1 %v6046_v44  ;;  %v6115_v42 = vld [vmem:[#allocation2 + $0x718] ss:$28 sps:$4 sm:$0xff]   ;;  %v6116_v43 = vld [vmem:[#allocation2 + $0x910] ss:$28 sps:$4 sm:$0xff]   ;;  %v6082_v44 = vld [vmem:[#allocation2 + $0x3c8] ss:$28 sps:$4 sm:$0xff]  }
 0x1a1   :  { %3338 = vmatpush1.bf16.msra.mxu0 %v6019_v45  ;;  %5421 = vmatpush3.bf16.msra.mxu1 %v6050_v47  ;;  %v6089_v45 = vld [vmem:[#allocation2 + $0x404] ss:$28 sps:$4 sm:$0xff]  }
 0x1a2   :  { %3339 = vmatprep.subr.bf16.mxu0 %v6024_v46  ;;  %5422 = vmatprep.subr.bf16.mxu1 %v6051_v49  ;;  %v6120_v46 = vld [vmem:[#allocation2 + $0x750] ss:$28 sps:$4 sm:$0xff]   ;;  %v6121_v47 = vld [vmem:[#allocation2 + $0x948] ss:$28 sps:$4 sm:$0xff]   ;;  %v6087_v49 = vld [vmem:[#allocation2 + $0x400] ss:$28 sps:$4 sm:$0xff]  }
 0x1a5   :  { %3340 = vmatpush1.bf16.msra.mxu0 %v6022_v50  ;;  %5423 = vmatpush3.bf16.msra.mxu1 %v6055_v48  ;;  %v6094_v50 = vld [vmem:[#allocation2 + $0x43c] ss:$28 sps:$4 sm:$0xff]  }
 0x1a6   :  { %3341 = vmatprep.subr.bf16.mxu0 %v6027_v51  ;;  %5424 = vmatprep.subr.bf16.mxu1 %v6056_v52  ;;  %v6125_v51 = vld [vmem:[#allocation2 + $0x788] ss:$28 sps:$4 sm:$0xff]   ;;  %v6092_v48 = vld [vmem:[#allocation2 + $0x438] ss:$28 sps:$4 sm:$0xff]  }
 0x1a7   :  { %v6099_v52 = vld [vmem:[#allocation2 + $0x474] ss:$28 sps:$4 sm:$0xff]  }
 0x1a9   :  { %3342 = vmatpush1.bf16.msra.mxu0 %v6025_v53  ;;  %5425 = vmatpush3.bf16.msra.mxu1 %v6060_v55  ;;  %v6130_v53 = vld [vmem:[#allocation2 + $0x7c0] ss:$28 sps:$4 sm:$0xff]   ;;  %v6097_v55 = vld [vmem:[#allocation2 + $0x470] ss:$28 sps:$4 sm:$0xff]  }
 0x1aa   :  { %3343 = vmatprep.subr.bf16.mxu0 %v6030_v54  ;;  %5426 = vmatprep.subr.bf16.mxu1 %v6061_v56  ;;  %v6131_v54 = vld [vmem:[#allocation2 + $0x9b8] ss:$28 sps:$4 sm:$0xff]   ;;  %v6104_v56 = vld [vmem:[#allocation2 + $0x4ac] ss:$28 sps:$4 sm:$0xff]  }
 0x1ad   :  { %3344 = vmatpush1.bf16.msra.mxu0 %v6028_v57  ;;  %5427 = vmatpush3.bf16.msra.mxu1 %v6065_v58  ;;  %v6136_v57 = vld [vmem:[#allocation2 + $0x9f0] ss:$28 sps:$4 sm:$0xff]   ;;  %v6102_v58 = vld [vmem:[#allocation2 + $0x4a8] ss:$28 sps:$4 sm:$0xff]  }
 0x1ae   :  { %3345 = vmatprep.subr.bf16.mxu0 %v6034_v59  ;;  %5428 = vmatprep.subr.bf16.mxu1 %v6066_v60  ;;  %v6140_v59 = vld [vmem:[#allocation2 + $0x830] ss:$28 sps:$4 sm:$0xff]   ;;  %v6109_v60 = vld [vmem:[#allocation2 + $0x4e4] ss:$28 sps:$4 sm:$0xff]  }
 0x1b1   :  { %3346 = vmatpush1.bf16.msra.mxu0 %v6032_v61  ;;  %5429 = vmatpush3.bf16.msra.mxu1 %v6070_v63  ;;  %v6141_v61 = vld [vmem:[#allocation2 + $0xa28] ss:$28 sps:$4 sm:$0xff]  }
 0x1b2   :  { %3347 = vmatprep.subr.bf16.mxu0 %v6039_v62  ;;  %5436 = vmatprep.subr.bf16.mxu1 %v6071_v0  ;;  %v6107_v62 = vld [vmem:[#allocation2 + $0x4e0] ss:$28 sps:$4 sm:$0xff]   ;;  %v6145_v63 = vld [vmem:[#allocation2 + $0x868] ss:$28 sps:$4 sm:$0xff]  }
 0x1b3   :  { %v6114_v0 = vld [vmem:[#allocation2 + $0x51c] ss:$28 sps:$4 sm:$0xff]  }
 0x1b4   :  { %3528 = vmatmul.mubr.bf16.vlgmr.msra.gmra.mrb[4].mxu1 %v6828_v5 }
 0x1b5   :  { %3348 = vmatpush1.bf16.msra.mxu0 %v6037_v1  ;;  %5437 = vmatpush3.bf16.msra.mxu1 %v6075_v3  ;;  %v6146_v1 = vld [vmem:[#allocation2 + $0xa60] ss:$28 sps:$4 sm:$0xff]  }
 0x1b6   :  { %3349 = vmatprep.subr.bf16.mxu0 %v6044_v2  ;;  %5438 = vmatprep.subr.bf16.mxu1 %v6076_v4  ;;  %v6112_v2 = vld [vmem:[#allocation2 + $0x518] ss:$28 sps:$4 sm:$0xff]   ;;  %v6150_v3 = vld [vmem:[#allocation2 + $0x8a0] ss:$28 sps:$4 sm:$0xff]  }
 0x1b7   :  { %3567 = vmatprep.mubr.bf16.mxu1 %v6835_v32  ;;  %v6119_v4 = vld [vmem:[#allocation2 + $0x554] ss:$28 sps:$4 sm:$0xff]  }
 0x1b9   :  { %3350 = vmatpush1.bf16.msra.mxu0 %v6042_v6  ;;  %5439 = vmatpush3.bf16.msra.mxu1 %v6080_v8  ;;  %v6151_v6 = vld [vmem:[#allocation2 + $0xc58] ss:$28 sps:$4 sm:$0xff]  }
 0x1ba   :  { %3351 = vmatprep.subr.bf16.mxu0 %v6049_v7  ;;  %5440 = vmatprep.subr.bf16.mxu1 %v6081_v9  ;;  %v6117_v7 = vld [vmem:[#allocation2 + $0x550] ss:$28 sps:$4 sm:$0xff]   ;;  %v6155_v8 = vld [vmem:[#allocation2 + $0xa98] ss:$28 sps:$4 sm:$0xff]  }
 0x1bb   :  { %v6124_v9 = vld [vmem:[#allocation2 + $0x58c] ss:$28 sps:$4 sm:$0xff]  }
 0x1bd   :  { %3352 = vmatpush1.bf16.msra.mxu0 %v6047_v10  ;;  %5441 = vmatpush3.bf16.msra.mxu1 %v6085_v12  ;;  %v6156_v10 = vld [vmem:[#allocation2 + $0xc90] ss:$28 sps:$4 sm:$0xff]  }
 0x1be   :  { %3353 = vmatprep.subr.bf16.mxu0 %v6054_v11  ;;  %5442 = vmatprep.subr.bf16.mxu1 %v6086_v14  ;;  %v6122_v11 = vld [vmem:[#allocation2 + $0x588] ss:$28 sps:$4 sm:$0xff]   ;;  %v6160_v12 = vld [vmem:[#allocation2 + $0xad0] ss:$28 sps:$4 sm:$0xff]  }
 0x1bf   :  { %v6129_v14 = vld [vmem:[#allocation2 + $0x5c4] ss:$28 sps:$4 sm:$0xff]  }
 0x1c1   :  { %3354 = vmatpush1.bf16.msra.mxu0 %v6052_v15  ;;  %5443 = vmatpush3.bf16.msra.mxu1 %v6090_v18  ;;  %v6161_v15 = vld [vmem:[#allocation2 + $0xcc8] ss:$28 sps:$4 sm:$0xff]  }
 0x1c2   :  { %3355 = vmatprep.subr.bf16.mxu0 %v6059_v16  ;;  %5444 = vmatprep.subr.bf16.mxu1 %v6091_v19  ;;  %v6127_v16 = vld [vmem:[#allocation2 + $0x5c0] ss:$28 sps:$4 sm:$0xff]   ;;  %v6165_v18 = vld [vmem:[#allocation2 + $0xb08] ss:$28 sps:$4 sm:$0xff]  }
 0x1c3   :  { %v6134_v19 = vld [vmem:[#allocation2 + $0x5fc] ss:$28 sps:$4 sm:$0xff]  }
 0x1c5   :  { %3356 = vmatpush1.bf16.msra.mxu0 %v6057_v20  ;;  %5445 = vmatpush3.bf16.msra.mxu1 %v6095_v23  ;;  %v6166_v20 = vld [vmem:[#allocation2 + $0xd00] ss:$28 sps:$4 sm:$0xff]  }
 0x1c6   :  { %3357 = vmatprep.subr.bf16.mxu0 %v6064_v21  ;;  %5446 = vmatprep.subr.bf16.mxu1 %v6096_v24  ;;  %v6132_v21 = vld [vmem:[#allocation2 + $0x5f8] ss:$28 sps:$4 sm:$0xff]   ;;  %v6170_v23 = vld [vmem:[#allocation2 + $0xb40] ss:$28 sps:$4 sm:$0xff]  }
 0x1c7   :  { %v6139_v24 = vld [vmem:[#allocation2 + $0x634] ss:$28 sps:$4 sm:$0xff]  }
 0x1c9   :  { %3358 = vmatpush1.bf16.msra.mxu0 %v6062_v25  ;;  %5447 = vmatpush3.bf16.msra.mxu1 %v6100_v28  ;;  %v6171_v25 = vld [vmem:[#allocation2 + $0xd38] ss:$28 sps:$4 sm:$0xff]  }
 0x1ca   :  { %3359 = vmatprep.subr.bf16.mxu0 %v6069_v26  ;;  %5448 = vmatprep.subr.bf16.mxu1 %v6101_v29  ;;  %v6137_v26 = vld [vmem:[#allocation2 + $0x630] ss:$28 sps:$4 sm:$0xff]   ;;  %v6175_v28 = vld [vmem:[#allocation2 + $0xb78] ss:$28 sps:$4 sm:$0xff]  }
 0x1cb   :  { %v6144_v29 = vld [vmem:[#allocation2 + $0x66c] ss:$28 sps:$4 sm:$0xff]  }
 0x1cd   :  { %3360 = vmatpush1.bf16.msra.mxu0 %v6067_v30  ;;  %5449 = vmatpush3.bf16.msra.mxu1 %v6105_v34  ;;  %v6176_v30 = vld [vmem:[#allocation2 + $0xd70] ss:$28 sps:$4 sm:$0xff]  }
 0x1ce   :  { %3361 = vmatprep.subr.bf16.mxu0 %v6074_v31  ;;  %5450 = vmatprep.subr.bf16.mxu1 %v6106_v35  ;;  %v6142_v31 = vld [vmem:[#allocation2 + $0x668] ss:$28 sps:$4 sm:$0xff]   ;;  %v6180_v34 = vld [vmem:[#allocation2 + $0xbb0] ss:$28 sps:$4 sm:$0xff]  }
 0x1cf   :  { %v6149_v35 = vld [vmem:[#allocation2 + $0x6a4] ss:$28 sps:$4 sm:$0xff]  }
 0x1d1   :  { %3362 = vmatpush1.bf16.msra.mxu0 %v6072_v36  ;;  %5451 = vmatpush3.bf16.msra.mxu1 %v6110_v38  ;;  %v6181_v36 = vld [vmem:[#allocation2 + $0xda8] ss:$28 sps:$4 sm:$0xff]  }
 0x1d2   :  { %3372 = vmatprep.subr.bf16.mxu0 %v6079_v37  ;;  %5458 = vmatprep.subr.bf16.mxu1 %v6111_v39  ;;  %v6147_v37 = vld [vmem:[#allocation2 + $0x6a0] ss:$28 sps:$4 sm:$0xff]   ;;  %v6185_v38 = vld [vmem:[#allocation2 + $0xbe8] ss:$28 sps:$4 sm:$0xff]  }
 0x1d3   :  { %v6154_v39 = vld [vmem:[#allocation2 + $0x6dc] ss:$28 sps:$4 sm:$0xff]  }
 0x1d4   :  { %3364 = vmatmul.mubr.bf16.vlgmr.msra.gmra.mrb[4].mxu0 %v6828_v5  ;;  %3568 = vmatmul.mubr.bf16.vlgmr.msra.gmra.mrb[8].mxu1 %v6842_v13  ;;  %v6126_v5 = vld [vmem:[#allocation2 + $0x980] ss:$28 sps:$4 sm:$0xff]  }
 0x1d5   :  { %3373 = vmatpush1.bf16.msra.mxu0 %v6077_v40  ;;  %5459 = vmatpush3.bf16.msra.mxu1 %v6115_v42  ;;  %v6186_v40 = vld [vmem:[#allocation2 + $0xde0] ss:$28 sps:$4 sm:$0xff]  }
 0x1d6   :  { %3374 = vmatprep.subr.bf16.mxu0 %v6084_v41  ;;  %5460 = vmatprep.subr.bf16.mxu1 %v6116_v43  ;;  %v6152_v41 = vld [vmem:[#allocation2 + $0x6d8] ss:$28 sps:$4 sm:$0xff]   ;;  %v6190_v42 = vld [vmem:[#allocation2 + $0xc20] ss:$28 sps:$4 sm:$0xff]  }
 0x1d7   :  { %3607 = vmatprep.mubr.bf16.mxu1 %v6847_v17  ;;  %3404 = vmatprep.mubr.bf16.mxu0 %v6835_v32  ;;  %v6135_v32 = vld [vmem:[#allocation2 + $0x7f8] ss:$28 sps:$4 sm:$0xff]  }
 0x1d8   :  { %v6159_v43 = vld [vmem:[#allocation2 + $0x714] ss:$28 sps:$4 sm:$0xff]  }
 0x1d9   :  { %3375 = vmatpush1.bf16.msra.mxu0 %v6082_v44  ;;  %5461 = vmatpush3.bf16.msra.mxu1 %v6120_v46  ;;  %v6193_v44 = vld [vmem:[#allocation6 + $0x4] ss:$8 sps:$4 sm:$0xff]  }
 0x1da   :  { %3376 = vmatprep.subr.bf16.mxu0 %v6089_v45  ;;  %5462 = vmatprep.subr.bf16.mxu1 %v6121_v47  ;;  %v6157_v45 = vld [vmem:[#allocation2 + $0x710] ss:$28 sps:$4 sm:$0xff]  }
 0x1db   :  { %v6164_v46 = vld [vmem:[#allocation2 + $0x74c] ss:$28 sps:$4 sm:$0xff]  }
 0x1dc   :  { %v6191_v47 = vld [vmem:[#allocation6] ss:$8 sps:$4 sm:$0xff]  }
 0x1dd   :  { %3377 = vmatpush1.bf16.msra.mxu0 %v6087_v49  ;;  %5463 = vmatpush3.bf16.msra.mxu1 %v6125_v51  ;;  %v6199_v49 = vld [vmem:[#allocation6 + $0x14] ss:$8 sps:$4 sm:$0xff]  }
 0x1de   :  { %3378 = vmatprep.subr.bf16.mxu0 %v6094_v50  ;;  %5464 = vmatprep.subr.bf16.mxu1 %v6126_v5  ;;  %v6162_v50 = vld [vmem:[#allocation2 + $0x748] ss:$28 sps:$4 sm:$0xff]   ;;  %v6197_v5 = vld [vmem:[#allocation6 + $0x10] ss:$8 sps:$4 sm:$0xff]  }
 0x1df   :  { %v6169_v51 = vld [vmem:[#allocation2 + $0x784] ss:$28 sps:$4 sm:$0xff]  }
 0x1e1   :  { %3379 = vmatpush1.bf16.msra.mxu0 %v6092_v48  ;;  %5465 = vmatpush3.bf16.msra.mxu1 %v6130_v53  ;;  %v6205_v48 = vld [vmem:[#allocation6 + $0x24] ss:$8 sps:$4 sm:$0xff]   ;;  %v6174_v53 = vld [vmem:[#allocation2 + $0x7bc] ss:$28 sps:$4 sm:$0xff]  }
 0x1e2   :  { %3380 = vmatprep.subr.bf16.mxu0 %v6099_v52  ;;  %5466 = vmatprep.subr.bf16.mxu1 %v6131_v54  ;;  %v6167_v52 = vld [vmem:[#allocation2 + $0x780] ss:$28 sps:$4 sm:$0xff]   ;;  %v6203_v54 = vld [vmem:[#allocation6 + $0x20] ss:$8 sps:$4 sm:$0xff]  }
 0x1e5   :  { %3381 = vmatpush1.bf16.msra.mxu0 %v6097_v55  ;;  %5467 = vmatpush3.bf16.msra.mxu1 %v6135_v32  ;;  %v6211_v55 = vld [vmem:[#allocation6 + $0x34] ss:$8 sps:$4 sm:$0xff]   ;;  %v6179_v32 = vld [vmem:[#allocation2 + $0x7f4] ss:$28 sps:$4 sm:$0xff]  }
 0x1e6   :  { %3382 = vmatprep.subr.bf16.mxu0 %v6104_v56  ;;  %5468 = vmatprep.subr.bf16.mxu1 %v6136_v57  ;;  %v6209_v56 = vld [vmem:[#allocation6 + $0x30] ss:$8 sps:$4 sm:$0xff]   ;;  %v6217_v57 = vld [vmem:[#allocation6 + $0x44] ss:$8 sps:$4 sm:$0xff]  }
 0x1e9   :  { %3383 = vmatpush1.bf16.msra.mxu0 %v6102_v58  ;;  %5469 = vmatpush3.bf16.msra.mxu1 %v6140_v59  ;;  %v6177_v58 = vld [vmem:[#allocation2 + $0x7f0] ss:$28 sps:$4 sm:$0xff]  }
 0x1ea   :  { %3384 = vmatprep.subr.bf16.mxu0 %v6109_v60  ;;  %5470 = vmatprep.subr.bf16.mxu1 %v6141_v61  ;;  %v6215_v59 = vld [vmem:[#allocation6 + $0x40] ss:$8 sps:$4 sm:$0xff]   ;;  %v6223_v60 = vld [vmem:[#allocation6 + $0x54] ss:$8 sps:$4 sm:$0xff]  }
 0x1eb   :  { %v6182_v61 = vld [vmem:[#allocation2 + $0x828] ss:$28 sps:$4 sm:$0xff]  }
 0x1ed   :  { %3385 = vmatpush1.bf16.msra.mxu0 %v6107_v62  ;;  %5471 = vmatpush3.bf16.msra.mxu1 %v6145_v63  ;;  %v6221_v62 = vld [vmem:[#allocation6 + $0x50] ss:$8 sps:$4 sm:$0xff]  }
 0x1ee   :  { %3386 = vmatprep.subr.bf16.mxu0 %v6114_v0  ;;  %5472 = vmatprep.subr.bf16.mxu1 %v6146_v1  ;;  %v6189_v63 = vld [vmem:[#allocation2 + $0x864] ss:$28 sps:$4 sm:$0xff]   ;;  %v6229_v0 = vld [vmem:[#allocation6 + $0x64] ss:$8 sps:$4 sm:$0xff]  }
 0x1ef   :  { %v6187_v1 = vld [vmem:[#allocation2 + $0x860] ss:$28 sps:$4 sm:$0xff]  }
 0x1f1   :  { %3387 = vmatpush1.bf16.msra.mxu0 %v6112_v2  ;;  %5473 = vmatpush3.bf16.msra.mxu1 %v6150_v3  ;;  %v6227_v2 = vld [vmem:[#allocation6 + $0x60] ss:$8 sps:$4 sm:$0xff]   ;;  %v6196_v3 = vld [vmem:[#allocation2 + $0x89c] ss:$28 sps:$4 sm:$0xff]  }
 0x1f2   :  { %3388 = vmatprep.subr.bf16.mxu0 %v6119_v4  ;;  %5480 = vmatprep.subr.bf16.mxu1 %v6151_v6  ;;  %v6235_v4 = vld [vmem:[#allocation6 + $0x74] ss:$8 sps:$4 sm:$0xff]   ;;  %v6194_v6 = vld [vmem:[#allocation2 + $0x898] ss:$28 sps:$4 sm:$0xff]  }
 0x1f4   :  { %3608 = vmatmul.mubr.bf16.vlgmr.msra.gmra.mrb[12].mxu1 %v6856_v22 }
 0x1f5   :  { %3389 = vmatpush1.bf16.msra.mxu0 %v6117_v7  ;;  %5481 = vmatpush3.bf16.msra.mxu1 %v6155_v8  ;;  %v6233_v7 = vld [vmem:[#allocation6 + $0x70] ss:$8 sps:$4 sm:$0xff]   ;;  %v6202_v8 = vld [vmem:[#allocation2 + $0x8d4] ss:$28 sps:$4 sm:$0xff]  }
 0x1f6   :  { %3390 = vmatprep.subr.bf16.mxu0 %v6124_v9  ;;  %5482 = vmatprep.subr.bf16.mxu1 %v6156_v10  ;;  %v6241_v9 = vld [vmem:[#allocation6 + $0x84] ss:$8 sps:$4 sm:$0xff]  }
 0x1f7   :  { %3647 = vmatprep.mubr.bf16.mxu1 %v6861_v27  ;;  %v6200_v10 = vld [vmem:[#allocation2 + $0x8d0] ss:$28 sps:$4 sm:$0xff]  }
 0x1f9   :  { %3391 = vmatpush1.bf16.msra.mxu0 %v6122_v11  ;;  %5483 = vmatpush3.bf16.msra.mxu1 %v6160_v12  ;;  %v6239_v11 = vld [vmem:[#allocation6 + $0x80] ss:$8 sps:$4 sm:$0xff]  }
 0x1fa   :  { %3392 = vmatprep.subr.bf16.mxu0 %v6129_v14  ;;  %5484 = vmatprep.subr.bf16.mxu1 %v6161_v15  ;;  %v6208_v12 = vld [vmem:[#allocation2 + $0x90c] ss:$28 sps:$4 sm:$0xff]   ;;  %v6247_v14 = vld [vmem:[#allocation6 + $0x94] ss:$8 sps:$4 sm:$0xff]  }
 0x1fb   :  { %v6206_v15 = vld [vmem:[#allocation2 + $0x908] ss:$28 sps:$4 sm:$0xff]  }
 0x1fd   :  { %3393 = vmatpush1.bf16.msra.mxu0 %v6127_v16  ;;  %5485 = vmatpush3.bf16.msra.mxu1 %v6165_v18  ;;  %v6245_v16 = vld [vmem:[#allocation6 + $0x90] ss:$8 sps:$4 sm:$0xff]  }
 0x1fe   :  { %3394 = vmatprep.subr.bf16.mxu0 %v6134_v19  ;;  %5486 = vmatprep.subr.bf16.mxu1 %v6166_v20  ;;  %v6214_v18 = vld [vmem:[#allocation2 + $0x944] ss:$28 sps:$4 sm:$0xff]   ;;  %v6253_v19 = vld [vmem:[#allocation6 + $0xa4] ss:$8 sps:$4 sm:$0xff]  }
 0x1ff   :  { %v6212_v20 = vld [vmem:[#allocation2 + $0x940] ss:$28 sps:$4 sm:$0xff]  }
 0x201   :  { %3395 = vmatpush1.bf16.msra.mxu0 %v6132_v21  ;;  %5487 = vmatpush3.bf16.msra.mxu1 %v6170_v23  ;;  %v6251_v21 = vld [vmem:[#allocation6 + $0xa0] ss:$8 sps:$4 sm:$0xff]   ;;  %v6220_v23 = vld [vmem:[#allocation2 + $0x97c] ss:$28 sps:$4 sm:$0xff]  }
 0x202   :  { %3396 = vmatprep.subr.bf16.mxu0 %v6139_v24  ;;  %5488 = vmatprep.subr.bf16.mxu1 %v6171_v25  ;;  %v6259_v24 = vld [vmem:[#allocation6 + $0xb4] ss:$8 sps:$4 sm:$0xff]   ;;  %v6218_v25 = vld [vmem:[#allocation2 + $0x978] ss:$28 sps:$4 sm:$0xff]  }
 0x205   :  { %3397 = vmatpush1.bf16.msra.mxu0 %v6137_v26  ;;  %5489 = vmatpush3.bf16.msra.mxu1 %v6175_v28  ;;  %v6257_v26 = vld [vmem:[#allocation6 + $0xb0] ss:$8 sps:$4 sm:$0xff]   ;;  %v6226_v28 = vld [vmem:[#allocation2 + $0x9b4] ss:$28 sps:$4 sm:$0xff]  }
 0x206   :  { %3398 = vmatprep.subr.bf16.mxu0 %v6144_v29  ;;  %5490 = vmatprep.subr.bf16.mxu1 %v6176_v30  ;;  %v6265_v29 = vld [vmem:[#allocation6 + $0xc4] ss:$8 sps:$4 sm:$0xff]  }
 0x207   :  { %v6224_v30 = vld [vmem:[#allocation2 + $0x9b0] ss:$28 sps:$4 sm:$0xff]  }
 0x209   :  { %3399 = vmatpush1.bf16.msra.mxu0 %v6142_v31  ;;  %5491 = vmatpush3.bf16.msra.mxu1 %v6180_v34  ;;  %v6263_v31 = vld [vmem:[#allocation6 + $0xc0] ss:$8 sps:$4 sm:$0xff]  }
 0x20a   :  { %3400 = vmatprep.subr.bf16.mxu0 %v6149_v35  ;;  %5492 = vmatprep.subr.bf16.mxu1 %v6181_v36  ;;  %v6232_v34 = vld [vmem:[#allocation2 + $0x9ec] ss:$28 sps:$4 sm:$0xff]   ;;  %v6271_v35 = vld [vmem:[#allocation6 + $0xd4] ss:$8 sps:$4 sm:$0xff]  }
 0x20b   :  { %v6230_v36 = vld [vmem:[#allocation2 + $0x9e8] ss:$28 sps:$4 sm:$0xff]  }
 0x20d   :  { %3401 = vmatpush1.bf16.msra.mxu0 %v6147_v37  ;;  %5493 = vmatpush3.bf16.msra.mxu1 %v6185_v38  ;;  %v6269_v37 = vld [vmem:[#allocation6 + $0xd0] ss:$8 sps:$4 sm:$0xff]  }
 0x20e   :  { %3402 = vmatprep.subr.bf16.mxu0 %v6154_v39  ;;  %5494 = vmatprep.subr.bf16.mxu1 %v6186_v40  ;;  %v6238_v38 = vld [vmem:[#allocation2 + $0xa24] ss:$28 sps:$4 sm:$0xff]   ;;  %v6277_v39 = vld [vmem:[#allocation6 + $0xe4] ss:$8 sps:$4 sm:$0xff]  }
 0x20f   :  { %v6236_v40 = vld [vmem:[#allocation2 + $0xa20] ss:$28 sps:$4 sm:$0xff]  }
 0x211   :  { %3403 = vmatpush1.bf16.msra.mxu0 %v6152_v41  ;;  %5495 = vmatpush3.bf16.msra.mxu1 %v6190_v42  ;;  %v6275_v41 = vld [vmem:[#allocation6 + $0xe0] ss:$8 sps:$4 sm:$0xff]   ;;  %v6244_v42 = vld [vmem:[#allocation2 + $0xa5c] ss:$28 sps:$4 sm:$0xff]  }
 0x212   :  { %3413 = vmatprep.subr.bf16.mxu0 %v6159_v43  ;;  %4353 = vmatprep.subr.bf16.mxu1 %v6193_v44  ;;  %v6283_v43 = vld [vmem:[#allocation6 + $0xf4] ss:$8 sps:$4 sm:$0xff]   ;;  %v6242_v44 = vld [vmem:[#allocation2 + $0xa58] ss:$28 sps:$4 sm:$0xff]  }
 0x214   :  { %3405 = vmatmul.mubr.bf16.vlgmr.msra.gmra.mrb[4].mxu0 %v6842_v13  ;;  %3648 = vmatmul.mubr.bf16.vlgmr.msra.gmra.mrb[16].mxu1 %v6870_v33  ;;  %v6172_v13 = vld [vmem:[#allocation2 + $0x7b8] ss:$28 sps:$4 sm:$0xff]  }
 0x215   :  { %3414 = vmatpush1.bf16.msra.mxu0 %v6157_v45  ;;  %4354 = vmatpush1.bf16.msra.mxu1 %v6191_v47  ;;  %v6281_v45 = vld [vmem:[#allocation6 + $0xf0] ss:$8 sps:$4 sm:$0xff]   ;;  %v6289_v47 = vld [vmem:[#allocation6 + $0x104] ss:$8 sps:$4 sm:$0xff]  }
 0x216   :  { %3415 = vmatprep.subr.bf16.mxu0 %v6164_v46  ;;  %4355 = vmatprep.subr.bf16.mxu1 %v6199_v49  ;;  %v6250_v46 = vld [vmem:[#allocation2 + $0xa94] ss:$28 sps:$4 sm:$0xff]  }
 0x217   :  { %3445 = vmatprep.mubr.bf16.mxu0 %v6847_v17  ;;  %v6184_v17 = vld [vmem:[#allocation2 + $0x82c] ss:$28 sps:$4 sm:$0xff]  }
 0x218   :  { %v6248_v49 = vld [vmem:[#allocation2 + $0xa90] ss:$28 sps:$4 sm:$0xff]  }
 0x219   :  { %3416 = vmatpush1.bf16.msra.mxu0 %v6162_v50  ;;  %4356 = vmatpush1.bf16.msra.mxu1 %v6197_v5  ;;  %v6256_v50 = vld [vmem:[#allocation2 + $0xacc] ss:$28 sps:$4 sm:$0xff]   ;;  %v6262_v5 = vld [vmem:[#allocation2 + $0xb04] ss:$28 sps:$4 sm:$0xff]  }
 0x21a   :  { %3417 = vmatprep.subr.bf16.mxu0 %v6169_v51  ;;  %4357 = vmatprep.subr.bf16.mxu1 %v6205_v48  ;;  %v6254_v51 = vld [vmem:[#allocation2 + $0xac8] ss:$28 sps:$4 sm:$0xff]   ;;  %v664_v48 = vlaneseq }
 0x21d   :  { %3418 = vmatpush1.bf16.msra.mxu0 %v6167_v52  ;;  %4358 = vmatpush1.bf16.msra.mxu1 %v6203_v54  ;;  %v6260_v52 = vld [vmem:[#allocation2 + $0xb00] ss:$28 sps:$4 sm:$0xff]   ;;  %v6889_v54 = vshrl.u32 %v664_v48, 7 }
 0x21e   :  { %3419 = vmatprep.subr.bf16.mxu0 %v6174_v53  ;;  %4359 = vmatprep.subr.bf16.mxu1 %v6211_v55  ;;  %v6268_v53 = vld [vmem:[#allocation2 + $0xb3c] ss:$28 sps:$4 sm:$0xff]   ;;  %v6334_v48 = vld [vmem:[#allocation2 + $0xda4] ss:$28 sps:$4 sm:$0xff]  }
 0x21f   :  { %v6266_v55 = vld [vmem:[#allocation2 + $0xb38] ss:$28 sps:$4 sm:$0xff]  }
 0x221   :  { %3420 = vmatpush1.bf16.msra.mxu0 %v6172_v13  ;;  %4360 = vmatpush1.bf16.msra.mxu1 %v6209_v56  ;;  %v6274_v13 = vld [vmem:[#allocation2 + $0xb74] ss:$28 sps:$4 sm:$0xff]   ;;  %v666_v56 = vsub.s32 0, %v6889_v54 }
 0x222   :  { %3421 = vmatprep.subr.bf16.mxu0 %v6179_v32  ;;  %4361 = vmatprep.subr.bf16.mxu1 %v6217_v57  ;;  %v6892_v32 = vld [vmem:[#allocation4] sm:$0xff]  ;;  %v678_v57 = vsub.s32 3, %v6889_v54 }
 0x225   :  { %3422 = vmatpush1.bf16.msra.mxu0 %v6177_v58  ;;  %4362 = vmatpush1.bf16.msra.mxu1 %v6215_v59  ;;  %v6280_v58 = vld [vmem:[#allocation2 + $0xbac] ss:$28 sps:$4 sm:$0xff]   ;;  %v667_v59 = vrot.slane %v6892_v32, %v666_v56 }
 0x226   :  { %3423 = vmatprep.subr.bf16.mxu0 %v6184_v17  ;;  %4363 = vmatprep.subr.bf16.mxu1 %v6223_v60  ;;  %v679_v60 = vrot.slane %v6892_v32, %v678_v57 }
 0x229   :  { %3424 = vmatpush1.bf16.msra.mxu0 %v6182_v61  ;;  %4364 = vmatpush1.bf16.msra.mxu1 %v6221_v62  ;;  %v6278_v61 = vld [vmem:[#allocation2 + $0xba8] ss:$28 sps:$4 sm:$0xff]  }
 0x22a   :  { %3425 = vmatprep.subr.bf16.mxu0 %v6189_v63  ;;  %4365 = vmatprep.subr.bf16.mxu1 %v6229_v0  ;;  %v6286_v62 = vld [vmem:[#allocation2 + $0xbe4] ss:$28 sps:$4 sm:$0xff]  }
 0x22d   :  { %3426 = vmatpush1.bf16.msra.mxu0 %v6187_v1  ;;  %4366 = vmatpush1.bf16.msra.mxu1 %v6227_v2 }
 0x22e   :  { %3427 = vmatprep.subr.bf16.mxu0 %v6196_v3  ;;  %4367 = vmatprep.subr.bf16.mxu1 %v6235_v4 }
 0x231   :  { %3428 = vmatpush1.bf16.msra.mxu0 %v6194_v6  ;;  %4368 = vmatpush1.bf16.msra.mxu1 %v6233_v7 }
 0x232   :  { %3429 = vmatprep.subr.bf16.mxu0 %v6202_v8  ;;  %4369 = vmatprep.subr.bf16.mxu1 %v6241_v9  ;;  %v6284_v9 = vld [vmem:[#allocation2 + $0xbe0] ss:$28 sps:$4 sm:$0xff]  }
 0x235   :  { %3430 = vmatpush1.bf16.msra.mxu0 %v6200_v10  ;;  %4370 = vmatpush1.bf16.msra.mxu1 %v6239_v11 }
 0x236   :  { %3431 = vmatprep.subr.bf16.mxu0 %v6208_v12  ;;  %4371 = vmatprep.subr.bf16.mxu1 %v6247_v14  ;;  %v6292_v14 = vld [vmem:[#allocation2 + $0xc1c] ss:$28 sps:$4 sm:$0xff]  }
 0x239   :  { %3432 = vmatpush1.bf16.msra.mxu0 %v6206_v15  ;;  %4372 = vmatpush1.bf16.msra.mxu1 %v6245_v16 }
 0x23a   :  { %3433 = vmatprep.subr.bf16.mxu0 %v6214_v18  ;;  %4373 = vmatprep.subr.bf16.mxu1 %v6253_v19  ;;  %v6287_v19 = vld [vmem:[#allocation6 + $0x100] ss:$8 sps:$4 sm:$0xff]  }
 0x23d   :  { %3434 = vmatpush1.bf16.msra.mxu0 %v6212_v20  ;;  %4374 = vmatpush1.bf16.msra.mxu1 %v6251_v21  ;;  %v6290_v20 = vld [vmem:[#allocation2 + $0xc18] ss:$28 sps:$4 sm:$0xff]  }
 0x23e   :  { %3435 = vmatprep.subr.bf16.mxu0 %v6220_v23  ;;  %4375 = vmatprep.subr.bf16.mxu1 %v6259_v24  ;;  %v6295_v23 = vld [vmem:[#allocation6 + $0x114] ss:$8 sps:$4 sm:$0xff]   ;;  %v6298_v24 = vld [vmem:[#allocation2 + $0xc54] ss:$28 sps:$4 sm:$0xff]  }
 0x241   :  { %3436 = vmatpush1.bf16.msra.mxu0 %v6218_v25  ;;  %4376 = vmatpush1.bf16.msra.mxu1 %v6257_v26  ;;  %v6293_v26 = vld [vmem:[#allocation6 + $0x110] ss:$8 sps:$4 sm:$0xff]  }
 0x242   :  { %3437 = vmatprep.subr.bf16.mxu0 %v6226_v28  ;;  %4377 = vmatprep.subr.bf16.mxu1 %v6265_v29  ;;  %v6296_v28 = vld [vmem:[#allocation2 + $0xc50] ss:$28 sps:$4 sm:$0xff]  }
 0x243   :  { %v6301_v29 = vld [vmem:[#allocation6 + $0x124] ss:$8 sps:$4 sm:$0xff]  }
 0x245   :  { %3438 = vmatpush1.bf16.msra.mxu0 %v6224_v30  ;;  %4378 = vmatpush1.bf16.msra.mxu1 %v6263_v31  ;;  %v6304_v30 = vld [vmem:[#allocation2 + $0xc8c] ss:$28 sps:$4 sm:$0xff]  }
 0x246   :  { %3439 = vmatprep.subr.bf16.mxu0 %v6232_v34  ;;  %4379 = vmatprep.subr.bf16.mxu1 %v6271_v35  ;;  %v6299_v31 = vld [vmem:[#allocation6 + $0x120] ss:$8 sps:$4 sm:$0xff]   ;;  %v6307_v35 = vld [vmem:[#allocation6 + $0x134] ss:$8 sps:$4 sm:$0xff]  }
 0x247   :  { %v6302_v34 = vld [vmem:[#allocation2 + $0xc88] ss:$28 sps:$4 sm:$0xff]  }
 0x249   :  { %3440 = vmatpush1.bf16.msra.mxu0 %v6230_v36  ;;  %4380 = vmatpush1.bf16.msra.mxu1 %v6269_v37  ;;  %v6310_v36 = vld [vmem:[#allocation2 + $0xcc4] ss:$28 sps:$4 sm:$0xff]  }
 0x24a   :  { %3441 = vmatprep.subr.bf16.mxu0 %v6238_v38  ;;  %4381 = vmatprep.subr.bf16.mxu1 %v6277_v39  ;;  %v6305_v37 = vld [vmem:[#allocation6 + $0x130] ss:$8 sps:$4 sm:$0xff]   ;;  %v6313_v39 = vld [vmem:[#allocation6 + $0x144] ss:$8 sps:$4 sm:$0xff]  }
 0x24b   :  { %v6308_v38 = vld [vmem:[#allocation2 + $0xcc0] ss:$28 sps:$4 sm:$0xff]  }
 0x24d   :  { %3442 = vmatpush1.bf16.msra.mxu0 %v6236_v40  ;;  %4382 = vmatpush1.bf16.msra.mxu1 %v6275_v41  ;;  %v6316_v40 = vld [vmem:[#allocation2 + $0xcfc] ss:$28 sps:$4 sm:$0xff]   ;;  %v6311_v41 = vld [vmem:[#allocation6 + $0x140] ss:$8 sps:$4 sm:$0xff]  }
 0x24e   :  { %3443 = vmatprep.subr.bf16.mxu0 %v6244_v42  ;;  %4383 = vmatprep.subr.bf16.mxu1 %v6283_v43  ;;  %v6314_v42 = vld [vmem:[#allocation2 + $0xcf8] ss:$28 sps:$4 sm:$0xff]   ;;  %v6319_v43 = vld [vmem:[#allocation6 + $0x154] ss:$8 sps:$4 sm:$0xff]  }
 0x251   :  { %3444 = vmatpush1.bf16.msra.mxu0 %v6242_v44  ;;  %4384 = vmatpush1.bf16.msra.mxu1 %v6281_v45  ;;  %v6322_v44 = vld [vmem:[#allocation2 + $0xd34] ss:$28 sps:$4 sm:$0xff]   ;;  %v6317_v45 = vld [vmem:[#allocation6 + $0x150] ss:$8 sps:$4 sm:$0xff]  }
 0x252   :  { %3454 = vmatprep.subr.bf16.mxu0 %v6250_v46  ;;  %4394 = vmatprep.subr.bf16.mxu1 %v6289_v47  ;;  %v6320_v46 = vld [vmem:[#allocation2 + $0xd30] ss:$28 sps:$4 sm:$0xff]  }
 0x253   :  { %v6325_v47 = vld [vmem:[#allocation6 + $0x164] ss:$8 sps:$4 sm:$0xff]  }
 0x254   :  { %3446 = vmatmul.mubr.bf16.vlgmr.msra.gmra.mrb[4].mxu0 %v6856_v22  ;;  %v6272_v22 = vld [vmem:[#allocation2 + $0xb70] ss:$28 sps:$4 sm:$0xff]  }
 0x255   :  { %3455 = vmatpush1.bf16.msra.mxu0 %v6248_v49  ;;  %3486 = vmatprep.mubr.bf16.mxu0 %v6861_v27  ;;  %v670_v27 = vsub.s32 1, %v6889_v54  ;;  %v6328_v49 = vld [vmem:[#allocation2 + $0xd6c] ss:$28 sps:$4 sm:$0xff]  }
 0x256   :  { %3456 = vmatprep.subr.bf16.mxu0 %v6256_v50  ;;  %v6323_v50 = vld [vmem:[#allocation6 + $0x160] ss:$8 sps:$4 sm:$0xff]  }
 0x257   :  { %v671_v17 = vrot.slane %v6892_v32, %v670_v27 }
 0x259   :  { %3457 = vmatpush1.bf16.msra.mxu0 %v6254_v51  ;;  %v6326_v51 = vld [vmem:[#allocation2 + $0xd68] ss:$28 sps:$4 sm:$0xff]  }
 0x25a   :  { %3458 = vmatprep.subr.bf16.mxu0 %v6262_v5  ;;  %v6331_v5 = vld [vmem:[#allocation6 + $0x174] ss:$8 sps:$4 sm:$0xff]  }
 0x25d   :  { %3459 = vmatpush1.bf16.msra.mxu0 %v6260_v52 }
 0x25e   :  { %3460 = vmatprep.subr.bf16.mxu0 %v6268_v53 }
 0x261   :  { %3461 = vmatpush1.bf16.msra.mxu0 %v6266_v55  ;;  %v6329_v55 = vld [vmem:[#allocation6 + $0x170] ss:$8 sps:$4 sm:$0xff]  }
 0x262   :  { %3462 = vmatprep.subr.bf16.mxu0 %v6274_v13  ;;  %v6332_v13 = vld [vmem:[#allocation2 + $0xda0] ss:$28 sps:$4 sm:$0xff]  }
 0x265   :  { %3463 = vmatpush1.bf16.msra.mxu0 %v6272_v22 }
 0x266   :  { %3464 = vmatprep.subr.bf16.mxu0 %v6280_v58  ;;  %v6337_v58 = vld [vmem:[#allocation6 + $0x184] ss:$8 sps:$4 sm:$0xff]  }
 0x267   :  { %v3160_v63 = vpop.f32.mrb[0].mxu0  ;;  %v6903_v0 = vpop.f32.mrb[0].mxu1 }
 0x268   :  { %v5553_v1 = vadd.f32 %v3160_v63, %v667_v59  ;;  %v3162_v2 = vpop.f32.mrb[1].mxu0  ;;  %v3326_v3 = vpop.f32.mrb[1].mxu1  ;;  %v6340_v59 = vld [vmem:[#allocation2 + $0xddc] ss:$28 sps:$4 sm:$0xff]  }
 0x269   :  { %v5554_v4 = vadd.f32 %v3162_v2, %v671_v17  ;;  %v5556_v6 = vadd.f32 %v3326_v3, %v679_v60  ;;  %v3164_v7 = vpop.f32.mrb[2].mxu0  ;;  %v3328_v8 = vpop.f32.mrb[2].mxu1  ;;  %3465 = vmatpush1.bf16.msra.mxu0 %v6278_v61  ;;  %v6335_v60 = vld [vmem:[#allocation6 + $0x180] ss:$8 sps:$4 sm:$0xff]   ;;  %v6338_v61 = vld [vmem:[#allocation2 + $0xdd8] ss:$28 sps:$4 sm:$0xff]  }
 0x26a   :  { %v3655_v10 = vmax.f32 %v5553_v1, 0.0  ;;  %v3165_v11 = vpop.f32.mrb[3].mxu0  ;;  %v3329_v12 = vpop.f32.mrb[3].mxu1  ;;  %3466 = vmatprep.subr.bf16.mxu0 %v6286_v62  ;;  %v6343_v62 = vld [vmem:[#allocation6 + $0x194] ss:$8 sps:$4 sm:$0xff]   ;;  %v674_v8 = vsub.s32 2, %v6889_v54 }
 0x26b   :  { %v3656_v15 = vmax.f32 %v5554_v4, 0.0  ;;  %v3658_v16 = vmax.f32 %v5556_v6, 0.0  ;;  %v6341_v63 = vld [vmem:[#allocation6 + $0x190] ss:$8 sps:$4 sm:$0xff]   ;;  %v6346_v1 = vld [vmem:[#allocation6 + $0x1a4] ss:$8 sps:$4 sm:$0xff]  }
 0x26c   :  { %v3662_v21 = vpack.c.bf16 %v3655_v10, %v3655_v10  ;;  %v6344_v2 = vld [vmem:[#allocation6 + $0x1a0] ss:$8 sps:$4 sm:$0xff]   ;;  %v6349_v3 = vld [vmem:[#allocation6 + $0x1b4] ss:$8 sps:$4 sm:$0xff]   ;;  %v6347_v4 = vld [vmem:[#allocation6 + $0x1b0] ss:$8 sps:$4 sm:$0xff]  }
 0x26d   :  { %v3663_v18 = vpack.c.bf16 %v3656_v15, %v3656_v15  ;;  %3467 = vmatpush1.bf16.msra.mxu0 %v6284_v9  ;;  %v3665_v25 = vpack.c.bf16 %v3658_v16, %v3658_v16  ;;  %v6352_v6 = vld [vmem:[#allocation6 + $0x1c4] ss:$8 sps:$4 sm:$0xff]   ;;  %v6350_v7 = vld [vmem:[#allocation6 + $0x1c0] ss:$8 sps:$4 sm:$0xff]   ;;  %v6355_v9 = vld [vmem:[#allocation6 + $0x1d4] ss:$8 sps:$4 sm:$0xff]  }
 0x26e   :  { %3468 = vmatprep.subr.bf16.mxu0 %v6292_v14  ;;  %v690_v10 = vsub.s32 6, %v6889_v54  ;;  %v6353_v11 = vld [vmem:[#allocation6 + $0x1d0] ss:$8 sps:$4 sm:$0xff]   ;;  %v6358_v12 = vld [vmem:[#allocation6 + $0x1e4] ss:$8 sps:$4 sm:$0xff]  }
 0x26f   :  { %4385 = vmatprep.mubr.bf16.mxu1 %v3663_v18  ;;  %v6356_v15 = vld [vmem:[#allocation6 + $0x1e0] ss:$8 sps:$4 sm:$0xff]   ;;  %v6361_v18 = vld [vmem:[#allocation6 + $0x1f4] ss:$8 sps:$4 sm:$0xff]  }
 0x270   :  { %4386 = vmatmul.mubr.bf16.vlgmr.msra.gmra.mrb[20].mxu1 %v3662_v21  ;;  %v691_v14 = vrot.slane %v6892_v32, %v690_v10 }
 0x271   :  { %4395 = vmatpush1.bf16.msra.mxu1 %v6287_v19  ;;  %3469 = vmatpush1.bf16.msra.mxu0 %v6290_v20 }
 0x272   :  { %4426 = vmatprep.mubr.bf16.mxu1 %v3665_v25  ;;  %4396 = vmatprep.subr.bf16.mxu1 %v6295_v23  ;;  %v6359_v23 = vld [vmem:[#allocation6 + $0x1f0] ss:$8 sps:$4 sm:$0xff]  }
 0x273   :  { %3470 = vmatprep.subr.bf16.mxu0 %v6298_v24 }
 0x275   :  { %4397 = vmatpush1.bf16.msra.mxu1 %v6293_v26  ;;  %3471 = vmatpush1.bf16.msra.mxu0 %v6296_v28 }
 0x276   :  { %4398 = vmatprep.subr.bf16.mxu1 %v6301_v29  ;;  %3472 = vmatprep.subr.bf16.mxu0 %v6304_v30  ;;  %v6364_v29 = vld [vmem:[#allocation6 + $0x204] ss:$8 sps:$4 sm:$0xff]  }
 0x279   :  { %4399 = vmatpush1.bf16.msra.mxu1 %v6299_v31  ;;  %3473 = vmatpush1.bf16.msra.mxu0 %v6302_v34  ;;  %v6362_v31 = vld [vmem:[#allocation6 + $0x200] ss:$8 sps:$4 sm:$0xff]  }
 0x27a   :  { %4400 = vmatprep.subr.bf16.mxu1 %v6307_v35  ;;  %3474 = vmatprep.subr.bf16.mxu0 %v6310_v36  ;;  %v6367_v35 = vld [vmem:[#allocation6 + $0x214] ss:$8 sps:$4 sm:$0xff]   ;;  %v6370_v36 = vld [vmem:[#allocation6 + $0x224] ss:$8 sps:$4 sm:$0xff]  }
 0x27d   :  { %4401 = vmatpush1.bf16.msra.mxu1 %v6305_v37  ;;  %3475 = vmatpush1.bf16.msra.mxu0 %v6308_v38  ;;  %v6368_v37 = vld [vmem:[#allocation6 + $0x220] ss:$8 sps:$4 sm:$0xff]   ;;  %v6373_v38 = vld [vmem:[#allocation6 + $0x234] ss:$8 sps:$4 sm:$0xff]  }
 0x27e   :  { %4402 = vmatprep.subr.bf16.mxu1 %v6313_v39  ;;  %3476 = vmatprep.subr.bf16.mxu0 %v6316_v40  ;;  %v6371_v39 = vld [vmem:[#allocation6 + $0x230] ss:$8 sps:$4 sm:$0xff]   ;;  %v6376_v40 = vld [vmem:[#allocation6 + $0x244] ss:$8 sps:$4 sm:$0xff]  }
 0x281   :  { %4403 = vmatpush1.bf16.msra.mxu1 %v6311_v41  ;;  %3477 = vmatpush1.bf16.msra.mxu0 %v6314_v42  ;;  %v6374_v41 = vld [vmem:[#allocation6 + $0x240] ss:$8 sps:$4 sm:$0xff]   ;;  %v6379_v42 = vld [vmem:[#allocation6 + $0x254] ss:$8 sps:$4 sm:$0xff]  }
 0x282   :  { %4404 = vmatprep.subr.bf16.mxu1 %v6319_v43  ;;  %3478 = vmatprep.subr.bf16.mxu0 %v6322_v44  ;;  %v6377_v43 = vld [vmem:[#allocation6 + $0x250] ss:$8 sps:$4 sm:$0xff]   ;;  %v6382_v44 = vld [vmem:[#allocation6 + $0x264] ss:$8 sps:$4 sm:$0xff]  }
 0x285   :  { %4405 = vmatpush1.bf16.msra.mxu1 %v6317_v45  ;;  %3479 = vmatpush1.bf16.msra.mxu0 %v6320_v46  ;;  %v6380_v45 = vld [vmem:[#allocation6 + $0x260] ss:$8 sps:$4 sm:$0xff]   ;;  %v6385_v46 = vld [vmem:[#allocation6 + $0x274] ss:$8 sps:$4 sm:$0xff]  }
 0x286   :  { %4406 = vmatprep.subr.bf16.mxu1 %v6325_v47  ;;  %3480 = vmatprep.subr.bf16.mxu0 %v6328_v49 }
 0x287   :  { %v5430_v52 = vpop.f32.mrb[4].mxu1 }
 0x288   :  { %v5431_v53 = vpop.f32.mrb[5].mxu1 }
 0x289   :  { %4407 = vmatpush1.bf16.msra.mxu1 %v6323_v50  ;;  %3481 = vmatpush1.bf16.msra.mxu0 %v6326_v51  ;;  %v5432_v22 = vadd.f32 %v5431_v53, %v5430_v52  ;;  %v5433_v57 = vpop.f32.mrb[6].mxu1  ;;  %v6388_v52 = vld [vmem:[#allocation6 + $0x284] ss:$8 sps:$4 sm:$0xff]  }
 0x28a   :  { %4408 = vmatprep.subr.bf16.mxu1 %v6331_v5  ;;  %3482 = vmatprep.subr.bf16.mxu0 %v6334_v48  ;;  %v5434_v17 = vpop.f32.mrb[7].mxu1  ;;  %v6383_v5 = vld [vmem:[#allocation6 + $0x270] ss:$8 sps:$4 sm:$0xff]   ;;  %v6394_v57 = vld [vmem:[#allocation6 + $0x2a4] ss:$8 sps:$4 sm:$0xff]  }
 0x28b   :  { %v3530_v19 = vadd.f32 %v5432_v22, %v691_v14  ;;  %v6389_v22 = vld [vmem:[#allocation6 + $0x290] ss:$8 sps:$4 sm:$0xff]   ;;  %v6435_v14 = vld [vmem:[#allocation9] sm:$0xff]  }
 0x28c   :  { %v6395_v17 = vld [vmem:[#allocation6 + $0x2b0] ss:$8 sps:$4 sm:$0xff]  }
 0x28d   :  { %4409 = vmatpush1.bf16.msra.mxu1 %v6329_v55  ;;  %3483 = vmatpush1.bf16.msra.mxu0 %v6332_v13  ;;  %v6386_v55 = vld [vmem:[#allocation6 + $0x280] ss:$8 sps:$4 sm:$0xff]   ;;  %v6391_v13 = vld [vmem:[#allocation6 + $0x294] ss:$8 sps:$4 sm:$0xff]  }
 0x28e   :  { %4410 = vmatprep.subr.bf16.mxu1 %v6337_v58  ;;  %3484 = vmatprep.subr.bf16.mxu0 %v6340_v59  ;;  %v6392_v58 = vld [vmem:[#allocation6 + $0x2a0] ss:$8 sps:$4 sm:$0xff]   ;;  %v6397_v59 = vld [vmem:[#allocation6 + $0x2b4] ss:$8 sps:$4 sm:$0xff]  }
 0x291   :  { %4411 = vmatpush1.bf16.msra.mxu1 %v6335_v60  ;;  %3485 = vmatpush1.bf16.msra.mxu0 %v6338_v61  ;;  %v6400_v60 = vld [vmem:[#allocation6 + $0x2c4] ss:$8 sps:$4 sm:$0xff]   ;;  %v6398_v61 = vld [vmem:[#allocation6 + $0x2c0] ss:$8 sps:$4 sm:$0xff]  }
 0x292   :  { %4412 = vmatprep.subr.bf16.mxu1 %v6343_v62  ;;  %v6403_v62 = vld [vmem:[#allocation6 + $0x2d4] ss:$8 sps:$4 sm:$0xff]  }
 0x294   :  { %3487 = vmatmul.mubr.bf16.vlgmr.msra.gmra.mrb[4].mxu0 %v6870_v33  ;;  %v675_v33 = vrot.slane %v6892_v32, %v674_v8  ;;  %v6409_v8 = vld [vmem:[#allocation6 + $0x2f4] ss:$8 sps:$4 sm:$0xff]  }
 0x295   :  { %4413 = vmatpush1.bf16.msra.mxu1 %v6341_v63  ;;  %v6401_v63 = vld [vmem:[#allocation6 + $0x2d0] ss:$8 sps:$4 sm:$0xff]  }
 0x296   :  { %4414 = vmatprep.subr.bf16.mxu1 %v6346_v1  ;;  %v5555_v16 = vadd.f32 %v6903_v0, %v675_v33  ;;  %v6365_v0 = vld [vmem:[#allocation6 + $0x210] ss:$8 sps:$4 sm:$0xff]   ;;  %v6406_v1 = vld [vmem:[#allocation6 + $0x2e4] ss:$8 sps:$4 sm:$0xff]  }
 0x297   :  { %v6412_v33 = vld [vmem:[#allocation6 + $0x304] ss:$8 sps:$4 sm:$0xff]  }
 0x298   :  { %v3657_v26 = vmax.f32 %v5555_v16, 0.0  ;;  %v6437_v16 = vld [vmem:[#allocation9 + $0x8] sm:$0xff]  }
 0x299   :  { %4415 = vmatpush1.bf16.msra.mxu1 %v6344_v2 }
 0x29a   :  { %4416 = vmatprep.subr.bf16.mxu1 %v6349_v3  ;;  %v3664_v34 = vpack.c.bf16 %v3657_v26, %v3657_v26  ;;  %v6404_v3 = vld [vmem:[#allocation6 + $0x2e0] ss:$8 sps:$4 sm:$0xff]  }
 0x29b   :  { %v6445_v26 = vld [vmem:[#allocation9 + $0x28] sm:$0xff]  }
 0x29d   :  { %4417 = vmatpush1.bf16.msra.mxu1 %v6347_v4 }
 0x29e   :  { %4418 = vmatprep.subr.bf16.mxu1 %v6352_v6 }
 0x2a1   :  { %4419 = vmatpush1.bf16.msra.mxu1 %v6350_v7 }
 0x2a2   :  { %4420 = vmatprep.subr.bf16.mxu1 %v6355_v9 }
 0x2a5   :  { %4421 = vmatpush1.bf16.msra.mxu1 %v6353_v11  ;;  %v6407_v11 = vld [vmem:[#allocation6 + $0x2f0] ss:$8 sps:$4 sm:$0xff]  }
 0x2a6   :  { %4422 = vmatprep.subr.bf16.mxu1 %v6358_v12  ;;  %v6434_v12 = vld [vmem:[#allocation9 + $0x40] sm:$0xff]  }
 0x2a7   :  { %v5452_v20 = vpop.f32.mrb[8].mxu1  ;;  %5502 = vmatprep.subr.bf16.mxu0 %v6434_v12  ;;  %v6450_v12 = vld [vmem:[#allocation12] sm:$0xff]  }
 0x2a8   :  { %v5453_v21 = vpop.f32.mrb[9].mxu1  ;;  %5503 = vmatpush3.bf16.msra.mxu0 %v6435_v14 }
 0x2a9   :  { %4423 = vmatpush1.bf16.msra.mxu1 %v6356_v15  ;;  %v5454_v24 = vadd.f32 %v5453_v21, %v5452_v20  ;;  %v5455_v25 = vpop.f32.mrb[10].mxu1  ;;  %v6436_v15 = vld [vmem:[#allocation9 + $0x48] sm:$0xff]   ;;  %v6440_v20 = vld [vmem:[#allocation9 + $0x58] sm:$0xff]  }
 0x2aa   :  { %4424 = vmatprep.subr.bf16.mxu1 %v6361_v18  ;;  %v5456_v28 = vpop.f32.mrb[11].mxu1  ;;  %5504 = vmatprep.subr.bf16.mxu0 %v6436_v15  ;;  %v6438_v18 = vld [vmem:[#allocation9 + $0x50] sm:$0xff]   ;;  %v6441_v21 = vld [vmem:[#allocation9 + $0x18] sm:$0xff]   ;;  %v6444_v25 = vld [vmem:[#allocation9 + $0x68] sm:$0xff]  }
 0x2ab   :  { %v3570_v30 = vadd.f32 %v5454_v24, %v3530_v19  ;;  %v6439_v19 = vld [vmem:[#allocation9 + $0x10] sm:$0xff]   ;;  %v6443_v24 = vld [vmem:[#allocation9 + $0x20] sm:$0xff]   ;;  %v682_v28 = vsub.s32 4, %v6889_v54 }
 0x2ac   :  { %5505 = vmatpush3.bf16.msra.mxu0 %v6437_v16  ;;  %v6451_v15 = vld [vmem:[#allocation12 + $0x8] sm:$0xff]  }
 0x2ad   :  { %4425 = vmatpush1.bf16.msra.mxu1 %v6359_v23  ;;  %5506 = vmatprep.subr.bf16.mxu0 %v6438_v18  ;;  %v6442_v23 = vld [vmem:[#allocation9 + $0x60] sm:$0xff]   ;;  %v6455_v16 = vld [vmem:[#allocation12 + $0x28] sm:$0xff]   ;;  %v6456_v18 = vld [vmem:[#allocation12 + $0x30] sm:$0xff]  }
 0x2ae   :  { %4435 = vmatprep.subr.bf16.mxu1 %v6364_v29  ;;  %v686_v29 = vsub.s32 5, %v6889_v54  ;;  %v6453_v54 = vld [vmem:[#allocation12 + $0x18] sm:$0xff]  }
 0x2b0   :  { %4427 = vmatmul.mubr.bf16.vlgmr.msra.gmra.mrb[20].mxu1 %v3664_v34  ;;  %5507 = vmatpush3.bf16.msra.mxu0 %v6439_v19  ;;  %v6457_v19 = vld [vmem:[#allocation12 + $0x38] sm:$0xff]  }
 0x2b1   :  { %4436 = vmatpush1.bf16.msra.mxu1 %v6362_v31  ;;  %5508 = vmatprep.subr.bf16.mxu0 %v6440_v20  ;;  %v687_v31 = vrot.slane %v6892_v32, %v686_v29 }
 0x2b2   :  { %4437 = vmatprep.subr.bf16.mxu1 %v6367_v35 }
 0x2b4   :  { %5509 = vmatpush3.bf16.msra.mxu0 %v6441_v21  ;;  %v5388_v21 = vld [vmem:[#allocation10] ss:$0 sm:$0xff] }
 0x2b5   :  { %4438 = vmatpush1.bf16.msra.mxu1 %v6365_v0  ;;  %5510 = vmatprep.subr.bf16.mxu0 %v6442_v23 }
 0x2b6   :  { %4439 = vmatprep.subr.bf16.mxu1 %v6370_v36 }
 0x2b8   :  { %5511 = vmatpush3.bf16.msra.mxu0 %v6443_v24 }
 0x2b9   :  { %4440 = vmatpush1.bf16.msra.mxu1 %v6368_v37  ;;  %5512 = vmatprep.subr.bf16.mxu0 %v6444_v25 }
 0x2ba   :  { %4441 = vmatprep.subr.bf16.mxu1 %v6373_v38 }
 0x2bc   :  { %5513 = vmatpush3.bf16.msra.mxu0 %v6445_v26 }
 0x2bd   :  { %4442 = vmatpush1.bf16.msra.mxu1 %v6371_v39 }
 0x2be   :  { %4443 = vmatprep.subr.bf16.mxu1 %v6376_v40 }
 0x2c1   :  { %4444 = vmatpush1.bf16.msra.mxu1 %v6374_v41 }
 0x2c2   :  { %4445 = vmatprep.subr.bf16.mxu1 %v6379_v42  ;;  %v6410_v42 = vld [vmem:[#allocation6 + $0x300] ss:$8 sps:$4 sm:$0xff]  }
 0x2c5   :  { %4446 = vmatpush1.bf16.msra.mxu1 %v6377_v43 }
 0x2c6   :  { %4447 = vmatprep.subr.bf16.mxu1 %v6382_v44  ;;  %v6415_v44 = vld [vmem:[#allocation6 + $0x314] ss:$8 sps:$4 sm:$0xff]  }
 0x2c7   :  { %v5474_v47 = vpop.f32.mrb[12].mxu1 }
 0x2c8   :  { %v5475_v49 = vpop.f32.mrb[13].mxu1 }
 0x2c9   :  { %v5476_v50 = vadd.f32 %v5475_v49, %v5474_v47  ;;  %v5477_v51 = vpop.f32.mrb[14].mxu1  ;;  %4448 = vmatpush1.bf16.msra.mxu1 %v6380_v45  ;;  %v6413_v45 = vld [vmem:[#allocation6 + $0x310] ss:$8 sps:$4 sm:$0xff]   ;;  %v6416_v47 = vld [vmem:[#allocation6 + $0x320] ss:$8 sps:$4 sm:$0xff]  }
 0x2ca   :  { %v5478_v48 = vpop.f32.mrb[15].mxu1  ;;  %4449 = vmatprep.subr.bf16.mxu1 %v6385_v46  ;;  %v6662_v46 = vmov 0   ;;  %v6421_v49 = vld [vmem:[#allocation6 + $0x334] ss:$8 sps:$4 sm:$0xff]   ;;  %v6424_v51 = vld [vmem:[#allocation6 + $0x344] ss:$8 sps:$4 sm:$0xff]  }
 0x2cb   :  { %v3610_v53 = vadd.f32 %v5476_v50, %v3570_v30  ;;  %v683_v30 = vrot.slane %v6892_v32, %v682_v28  ;;  %v6418_v32 = vld [vmem:[#allocation6 + $0x324] ss:$8 sps:$4 sm:$0xff]   ;;  %v6419_v50 = vld [vmem:[#allocation6 + $0x330] ss:$8 sps:$4 sm:$0xff]   ;;  %v6427_v48 = vld [vmem:[#allocation6 + $0x354] ss:$8 sps:$4 sm:$0xff]  }
 0x2cd   :  { %4450 = vmatpush1.bf16.msra.mxu1 %v6383_v5  ;;  %v6422_v5 = vld [vmem:[#allocation6 + $0x340] ss:$8 sps:$4 sm:$0xff]  }
 0x2ce   :  { %4451 = vmatprep.subr.bf16.mxu1 %v6388_v52  ;;  %v6425_v52 = vld [vmem:[#allocation6 + $0x350] ss:$8 sps:$4 sm:$0xff]  }
 0x2d1   :  { %4452 = vmatpush1.bf16.msra.mxu1 %v6386_v55  ;;  %v6428_v55 = vld [vmem:[#allocation6 + $0x360] ss:$8 sps:$4 sm:$0xff]  }
 0x2d2   :  { %4453 = vmatprep.subr.bf16.mxu1 %v6391_v13  ;;  %v6433_v13 = vld [vmem:[#allocation6 + $0x374] ss:$8 sps:$4 sm:$0xff]  }
 0x2d5   :  { %4454 = vmatpush1.bf16.msra.mxu1 %v6389_v22  ;;  %v6431_v22 = vld [vmem:[#allocation6 + $0x370] ss:$8 sps:$4 sm:$0xff]  }
 0x2d6   :  { %4455 = vmatprep.subr.bf16.mxu1 %v6394_v57 }
 0x2d9   :  { %4456 = vmatpush1.bf16.msra.mxu1 %v6392_v58 }
 0x2da   :  { %4457 = vmatprep.subr.bf16.mxu1 %v6397_v59  ;;  %v6446_v59 = vld [vmem:[#allocation9 + $0x70] sm:$0xff]  }
 0x2db   :  { %5514 = vmatprep.subr.bf16.mxu0 %v6446_v59 }
 0x2dd   :  { %4458 = vmatpush1.bf16.msra.mxu1 %v6395_v17  ;;  %v6447_v17 = vld [vmem:[#allocation9 + $0x30] sm:$0xff]  }
 0x2de   :  { %4459 = vmatprep.subr.bf16.mxu1 %v6400_v60  ;;  %5515 = vmatpush3.bf16.msra.mxu0 %v6447_v17  ;;  %v6448_v60 = vld [vmem:[#allocation9 + $0x78] sm:$0xff]  }
 0x2df   :  { %5516 = vmatprep.subr.bf16.mxu0 %v6448_v60 }
 0x2e1   :  { %4460 = vmatpush1.bf16.msra.mxu1 %v6398_v61  ;;  %v6449_v61 = vld [vmem:[#allocation9 + $0x38] sm:$0xff]  }
 0x2e2   :  { %4461 = vmatprep.subr.bf16.mxu1 %v6403_v62  ;;  %5517 = vmatpush3.bf16.msra.mxu0 %v6449_v61  ;;  %v6663_v62 = vmov 0.0  }
 0x2e3   :  { %5533 = vmatprep.subr.bf16.mxu0 %v6663_v62 }
 0x2e5   :  { %4462 = vmatpush1.bf16.msra.mxu1 %v6401_v63  ;;  %v3781_v63 = vld [vmem:[#allocation7] sm:$0x3] }
 0x2e6   :  { %4463 = vmatprep.subr.bf16.mxu1 %v6406_v1  ;;  %v3786_v1 = vrot.slane %v3781_v63, %v666_v56  ;;  %v6452_v56 = vld [vmem:[#allocation12 + $0x10] sm:$0xff]  }
 0x2e7   :  { %v5496_v2 = vpop.f32.mrb[16].mxu1 }
 0x2e8   :  { %v5497_v4 = vpop.f32.mrb[17].mxu1 }
 0x2e9   :  { %v5498_v6 = vadd.f32 %v5497_v4, %v5496_v2  ;;  %4464 = vmatpush1.bf16.msra.mxu1 %v6404_v3  ;;  %v5499_v7 = vpop.f32.mrb[18].mxu1  ;;  %v3790_v2 = vrot.slane %v3781_v63, %v670_v27  ;;  %v6454_v27 = vld [vmem:[#allocation12 + $0x20] sm:$0xff]  }
 0x2ea   :  { %v5500_v9 = vpop.f32.mrb[19].mxu1  ;;  %4465 = vmatprep.subr.bf16.mxu1 %v6409_v8 }
 0x2eb   :  { %v6911_v10 = vadd.f32 %v5498_v6, %v3610_v53  ;;  %v6430_v53 = vld [vmem:[#allocation6 + $0x364] ss:$8 sps:$4 sm:$0xff]  }
 0x2ed   :  { %4466 = vmatpush1.bf16.msra.mxu1 %v6407_v11  ;;  %v3661_v57 = vmax.f32 %v6911_v10, 0.0 }
 0x2ee   :  { %4476 = vmatprep.subr.bf16.mxu1 %v6412_v33 }
 0x2ef   :  { %v3668_v58 = vpack.c.bf16 %v3661_v57, %v3661_v57 }
 0x367   :  { %v3488_v34 = vpop.f32.mrb[4].mxu0 }
 0x368   :  { %v5557_v35 = vadd.f32 %v3488_v34, %v683_v30  ;;  %v3490_v0 = vpop.f32.mrb[5].mxu0 }
 0x369   :  { %v5558_v36 = vadd.f32 %v3490_v0, %v687_v31  ;;  %v3492_v37 = vpop.f32.mrb[6].mxu0  ;;  %v5405_v31 = vld [vmem:[#allocation13] ss:$0 sm:$0xff] }
 0x36a   :  { %v3659_v38 = vmax.f32 %v5557_v35, 0.0  ;;  %v3493_v39 = vpop.f32.mrb[7].mxu0 }
 0x36b   :  { %v3660_v40 = vmax.f32 %v5558_v36, 0.0 }
 0x36c   :  { %v3666_v43 = vpack.c.bf16 %v3659_v38, %v3659_v38 }
 0x36d   :  { %v3667_v41 = vpack.c.bf16 %v3660_v40, %v3660_v40 }
 0x36f   :  { %4467 = vmatprep.mubr.bf16.mxu1 %v3667_v41 }
 0x370   :  { %4468 = vmatmul.mubr.bf16.vlgmr.msra.gmra.mrb[20].mxu1 %v3666_v43 }
 0x371   :  { %4477 = vmatpush1.bf16.msra.mxu1 %v6410_v42  ;;  %4508 = vmatprep.mubr.bf16.mxu1 %v6662_v46 }
 0x372   :  { %4478 = vmatprep.subr.bf16.mxu1 %v6415_v44 }
 0x375   :  { %4479 = vmatpush1.bf16.msra.mxu1 %v6413_v45 }
 0x376   :  { %4480 = vmatprep.subr.bf16.mxu1 %v6418_v32 }
 0x379   :  { %4481 = vmatpush1.bf16.msra.mxu1 %v6416_v47 }
 0x37a   :  { %4482 = vmatprep.subr.bf16.mxu1 %v6421_v49 }
 0x37d   :  { %4483 = vmatpush1.bf16.msra.mxu1 %v6419_v50 }
 0x37e   :  { %4484 = vmatprep.subr.bf16.mxu1 %v6424_v51 }
 0x381   :  { %4485 = vmatpush1.bf16.msra.mxu1 %v6422_v5 }
 0x382   :  { %4486 = vmatprep.subr.bf16.mxu1 %v6427_v48 }
 0x385   :  { %4487 = vmatpush1.bf16.msra.mxu1 %v6425_v52 }
 0x386   :  { %4488 = vmatprep.subr.bf16.mxu1 %v6430_v53 }
 0x389   :  { %4489 = vmatpush1.bf16.msra.mxu1 %v6428_v55 }
 0x38a   :  { %4490 = vmatprep.subr.bf16.mxu1 %v6433_v13 }
 0x38d   :  { %4491 = vmatpush1.bf16.msra.mxu1 %v6431_v22 }
 0x390   :  { %4509 = vmatmul.mubr.bf16.vlgmr.msra.gmra.mrb[20].mxu1 %v3668_v58 }
 0x463   :  { %v4510_v3 = vpop.f32.mrb[20].mxu1 }
 0x464   :  { %v5559_v4 = vadd.f32 %v4510_v3, %v3786_v1  ;;  %v4512_v6 = vpop.f32.mrb[21].mxu1 }
 0x465   :  { %v5560_v7 = vadd.f32 %v4512_v6, %v3790_v2  ;;  %v4514_v8 = vpop.f32.mrb[22].mxu1 }
 0x466   :  { %v4517_v9 = vmax.f32 %v5559_v4, 0.0  ;;  %v4515_v10 = vpop.f32.mrb[23].mxu1 }
 0x467   :  { %v4518_v11 = vmax.f32 %v5560_v7, 0.0 }
 0x468   :  { %v4519_v14 = vpack.c.bf16 %v4517_v9, %v4517_v9 }
 0x469   :  { %v4520_v33 = vpack.c.bf16 %v4518_v11, %v4518_v11 }
 0x46b   :  { %4688 = vmatprep.mubr.bf16.mxu0 %v4520_v33 }
 0x46c   :  { %4689 = vmatmul.mubr.bf16.vlgmr.msra.gmra.mrb[8].mxu0 %v4519_v14 }
 0x46d   :  { %5534 = vmatpush3.bf16.msra.mxu0 %v6450_v12  ;;  %5549 = vmatprep.mubr.msk.bf16.mxu0 %vm6664_vm0, %v6663_v62 }
 0x46e   :  { %5535 = vmatprep.subr.bf16.mxu0 %v6663_v62 }
 0x471   :  { %5536 = vmatpush3.bf16.msra.mxu0 %v6451_v15 }
 0x472   :  { %5537 = vmatprep.subr.bf16.mxu0 %v6663_v62 }
 0x475   :  { %5538 = vmatpush3.bf16.msra.mxu0 %v6452_v56 }
 0x476   :  { %5539 = vmatprep.subr.bf16.mxu0 %v6663_v62 }
 0x479   :  { %5540 = vmatpush3.bf16.msra.mxu0 %v6453_v54 }
 0x47a   :  { %5541 = vmatprep.subr.bf16.mxu0 %v6663_v62 }
 0x47d   :  { %5542 = vmatpush3.bf16.msra.mxu0 %v6454_v27 }
 0x47e   :  { %5543 = vmatprep.subr.bf16.mxu0 %v6663_v62 }
 0x481   :  { %5544 = vmatpush3.bf16.msra.mxu0 %v6455_v16 }
 0x482   :  { %5545 = vmatprep.subr.bf16.mxu0 %v6663_v62 }
 0x485   :  { %5546 = vmatpush3.bf16.msra.mxu0 %v6456_v18 }
 0x486   :  { %5547 = vmatprep.subr.bf16.mxu0 %v6663_v62 }
 0x489   :  { %5548 = vmatpush3.bf16.msra.mxu0 %v6457_v19 }
 0x53f   :  { %v5518_v20 = vpop.f32.mrb[8].mxu0 }
 0x540   :  { %v5519_v23 = vpop.f32.mrb[9].mxu0 }
 0x541   :  { %v5520_v24 = vadd.f32 %v5519_v23, %v5518_v20  ;;  %v5521_v25 = vpop.f32.mrb[10].mxu0 }
 0x542   :  { %v5522_v26 = vpop.f32.mrb[11].mxu0 }
 0x543   :  { %v4691_v28 = vadd.f32 %v5520_v24, %v5388_v21 }
 0x545   :  { %v4696_v29 = vmax.f32 %v4691_v28, 0.0 }
 0x547   :  { %v4697_v30 = vpack.c.bf16 %v4696_v29, %v4696_v29 }
 0x549   :  { %5550 = vmatmul.mubr.bf16.vlgmr.msra.gmra.mrb[12].mxu0 %v4697_v30 }
 0x61c   :  { %v4803_v34 = vpop.f32.mrb[12].mxu0 }
 0x61d   :  { %v4804_v35 = vadd.f32 %v5405_v31, %v4803_v34  ;;  %v5551_v0 = vpop.f32.mrb[13].mxu0 }
 0x61e   :  { %v4806_v36 = vpop.f32.mrb[14].mxu0 }
 0x61f   :  { %4809 = vmax.xlane.f32.xlu0 %v4804_v35  ;;  %v5552_v37 = vpop.f32.mrb[15].mxu0 }
 0x6ac   :  { %v4810_v38 = vpop.xlane.xlu0 %4809 }
 0x6ad   :  { %v4811_v39 = vsub.f32 %v4804_v35, %v4810_v38 }
 0x6af   :  { %v4812_v40 = vmul.f32 1.442695, %v4811_v39 }
 0x6b1   :  { %6458 = vpow2.f32 %v4812_v40 }
 0x6bb   :  { %v6459_v41 = vpop.eup %6458 }
 0x6bc   :  { %4814 = vadd.xlane.f32.xlu0 %v6459_v41 }
 0x749   :  { %v4815_v42 = vpop.xlane.xlu0 %4814 }
 0x74a   :  { %6460 = vrcp.f32 %v4815_v42 }
 0x754   :  { %v6461_v43 = vpop.eup %6460 }
 0x755   :  { %v4817_v44 = vmul.f32 %v6461_v43, %v6459_v41 }
 0x757   :  { %4818 = vst [vmem:[%s6934_s9] sm:$0xff] %v4817_v44 }
 0x758   :  { %4823 = vsyncpa [#allocation3], 1 }
 0x759   :  { %4824 = vsyncpa [#allocation5], 1 }
 0x75a   :  { %4825 = vsyncpa [#allocation8], 1 }
 0x75b   :  { %4826 = vsyncpa [#allocation11], 1 }
 0x75c   :  { %4827 = vsyncpa [#allocation14], 1 }

</bundles_post_ra>
